<compile_context>
chip_gen: v7x
topology: tpu7x:2x2x1
jax: 0.10.0
libtpu: 0.0.40
codegen_flags: <defaults>
</compile_context>

<pallas_src>
import jax
import jax.numpy as jnp
from jax.experimental import pallas as pl
from jax.experimental.pallas import tpu as pltpu

BN_EPS = 1e-5


def _round_up(x, m):
    return (x + m - 1) // m * m


def _cdiv(a, b):
    return -(-a // b)


def _devise_kernel(x_ref, w1_ref, b1_ref, w2_ref, b2_ref, out_ref):
    # x_ref : (tile_b, D)   f32  (cast to bf16 in-kernel)
    # w1_ref: (D, tile_h)   bf16   b1_ref: (1, tile_h) f32
    # w2_ref: (tile_h, Op)  bf16   b2_ref: (1, Op)     f32
    # out_ref:(tile_b, Op)  f32  -- resident accumulator across the hidden axis
    hk = pl.program_id(1)

    @pl.when(hk == 0)
    def _():
        out_ref[...] = jnp.broadcast_to(b2_ref[...], out_ref.shape)

    xb = x_ref[...].astype(jnp.bfloat16)
    h = jnp.dot(xb, w1_ref[...], preferred_element_type=jnp.float32)
    h = jnp.maximum(h + b1_ref[...], 0.0)
    out_ref[...] += jnp.dot(h.astype(jnp.bfloat16), w2_ref[...],
                            preferred_element_type=jnp.float32)


def fold_params(params):
    """Fold eval-mode BatchNorms into the adjacent Linear layers (f32)."""
    (g1, be1, m1, v1, w1_t, b1, g2, be2, m2, v2, w2_t, b2) = params
    a1 = g1 * jax.lax.rsqrt(v1 + BN_EPS)          # BN1 scale
    c1 = be1 - m1 * a1                            # BN1 shift
    w1f = a1[:, None] * w1_t                      # (D, H)
    b1f = b1 + c1 @ w1_t                          # (H,)
    a2 = g2 * jax.lax.rsqrt(v2 + BN_EPS)
    c2 = be2 - m2 * a2
    w2f = a2[:, None] * w2_t                      # (H, O)
    b2f = b2 + c2 @ w2_t                          # (O,)
    return w1f, b1f, w2f, b2f


def _spec(shape, index_map, *, single_buffer=False):
    """BlockSpec; optionally single-buffered (grid-invariant operands)."""
    if single_buffer:
        try:
            return pl.BlockSpec(shape, index_map, pipeline_mode=pl.Buffered(1))
        except Exception:           # jax without pipeline_mode / Buffered
            pass
    return pl.BlockSpec(shape, index_map)


def devise_forward(x, params, *, tile_b=512, tile_h=None):
    """x: (N, input_dims) float32. Returns (N, output_dims) float32."""
    N, D = x.shape
    w1f, b1f, w2f, b2f = fold_params(params)
    H = w1f.shape[1]
    O = w2f.shape[1]

    # ---- lane-pad output dim to 128 (dense vst, MXU N fill) ----------------
    Op = _round_up(O, 128)
    if Op != O:
        w2f = jnp.pad(w2f, ((0, 0), (0, Op - O)))
        b2f = jnp.pad(b2f, ((0, Op - O),))

    # ---- batch tiling: never split a tiny batch just to get >1 grid step ---
    Nr = _round_up(N, 8)
    tile_b = max(8, min(_round_up(int(tile_b), 8), Nr))
    grid_b = _cdiv(N, tile_b)

    # ---- hidden tiling: lane-aligned divisors of H --------------------------
    h_cands = sorted({H} | {c for c in (128, 256, 512, 1024, 2048) if H % c == 0},
                     reverse=True)
    if tile_h is None:
        # Single batch tile -> stream the weights in chunks so the weight DMA
        # overlaps MXU work (latency).  Multiple batch tiles -> keep the
        # weights resident so they are read from HBM exactly once.
        tile_h = min(H, 512) if grid_b == 1 else H
    tile_h = next((c for c in h_cands if c <= int(tile_h)), h_cands[-1])

    # ---- VMEM budget (generation-aware) -------------------------------------
    try:
        vmem_cap = int(getattr(pltpu.get_tpu_info(), "vmem_capacity_bytes",
                               64 << 20))
    except Exception:
        vmem_cap = 64 << 20                    # conservative (v7x per-core)
    budget = int(vmem_cap * 0.85)

    def need(tb, th):
        bf16, f32 = 2, 4
        nbuf = 1 if th == H else 2             # weights single-buffered if resident
        return (2 * tb * D * f32               # x tiles (f32, double-buffered)
                + tb * D * bf16                # in-kernel bf16 copy of x tile
                + nbuf * D * th * bf16         # W1' block(s)
                + nbuf * th * f32              # b1' block(s)
                + nbuf * th * Op * bf16        # W2' block(s)
                + Op * f32                     # b2' (single-buffered)
                + 2 * tb * Op * f32            # out tiles
                + tb * th * (f32 + bf16))      # h intermediate (f32 + bf16)

    while need(tile_b, tile_h) > budget and tile_h > h_cands[-1]:
        tile_h = next(c for c in h_cands if c < tile_h)
    while need(tile_b, tile_h) > budget and tile_b > 8:
        tile_b = _round_up(max(tile_b // 2, 8), 8)
    # TODO(synk): K-tile the first matmul's contraction dim (block D) if a
    # single (D, 128) weight slab ever exceeds the VMEM budget.

    grid_b = _cdiv(N, tile_b)
    tile_b = _round_up(_cdiv(N, grid_b), 8)    # balance tiles (minimal padding)
    Np = grid_b * tile_b
    grid_h = H // tile_h

    vmem_limit = int(min(max(need(tile_b, tile_h) * 1.25 + (4 << 20), 32 << 20),
                         budget))

    # ---- operands ------------------------------------------------------------
    xp = x.astype(jnp.float32)
    if Np != N:
        xp = jnp.pad(xp, ((0, Np - N), (0, 0)))
    w1b = w1f.astype(jnp.bfloat16)
    w2b = w2f.astype(jnp.bfloat16)
    b1r = b1f.reshape(1, H).astype(jnp.float32)
    b2r = b2f.reshape(1, Op).astype(jnp.float32)

    w_passes = 1 if grid_h == 1 else grid_b
    cost = pl.CostEstimate(
        flops=2 * Np * D * H + 2 * Np * H * Op,
        transcendentals=0,
        bytes_accessed=int(Np * D * 4 + Np * Op * 4
                           + w_passes * (D * H + H * Op) * 2 + (H + Op) * 4),
    )

    def run(single_buffer):
        w_sb = single_buffer and grid_h == 1   # weights grid-invariant only then
        in_specs = [
            _spec((tile_b, D), lambda i, h: (i, 0)),                          # x
            _spec((D, tile_h), lambda i, h: (0, h), single_buffer=w_sb),      # W1'
            _spec((1, tile_h), lambda i, h: (0, h), single_buffer=w_sb),      # b1'
            _spec((tile_h, Op), lambda i, h: (h, 0), single_buffer=w_sb),     # W2'
            _spec((1, Op), lambda i, h: (0, 0), single_buffer=single_buffer), # b2'
        ]
        out_spec = pl.BlockSpec((tile_b, Op), lambda i, h: (i, 0))
        fn = pl.pallas_call(
            _devise_kernel,
            out_shape=jax.ShapeDtypeStruct((Np, Op), jnp.float32),
            grid_spec=pltpu.PrefetchScalarGridSpec(
                num_scalar_prefetch=0,
                grid=(grid_b, grid_h),
                in_specs=in_specs,
                out_specs=out_spec,
            ),
            compiler_params=pltpu.CompilerParams(
                dimension_semantics=("parallel", "arbitrary"),
                vmem_limit_bytes=vmem_limit,
            ),
            cost_estimate=cost,
        )
        return fn(xp, w1b, b1r, w2b, b2r)

    try:
        out = jax.block_until_ready(run(True))
    except Exception:
        # Fallback if pipeline_mode=pl.Buffered(1) is rejected by this Mosaic.
        out = run(False)

    # TODO(synk): consumers that tolerate the (Np, 128) padded f32 layout should
    # take `out` directly and skip this extra slice pass over HBM.
    return out[:N, :O]


def make_params(key, input_dims, hidden_dims, output_dims):
    ks = jax.random.split(key, 12)
    f32 = jnp.float32
    # BatchNorm1d(input_dims)
    g1 = jax.random.uniform(ks[0], (input_dims,), f32, 0.5, 1.5)
    be1 = jax.random.normal(ks[1], (input_dims,), f32) * 0.1
    m1 = jax.random.normal(ks[2], (input_dims,), f32) * 0.1
    v1 = jax.random.uniform(ks[3], (input_dims,), f32, 0.5, 1.5)
    # Linear(input_dims, hidden_dims): PyTorch weight is (out, in); store transposed.
    w1_t = jax.random.normal(ks[4], (input_dims, hidden_dims), f32) * (1.0 / jnp.sqrt(input_dims))
    b1 = jax.random.normal(ks[5], (hidden_dims,), f32) * 0.01
    # BatchNorm1d(hidden_dims)
    g2 = jax.random.uniform(ks[6], (hidden_dims,), f32, 0.5, 1.5)
    be2 = jax.random.normal(ks[7], (hidden_dims,), f32) * 0.1
    m2 = jax.random.normal(ks[8], (hidden_dims,), f32) * 0.1
    v2 = jax.random.uniform(ks[9], (hidden_dims,), f32, 0.5, 1.5)
    # Linear(hidden_dims, output_dims)
    w2_t = jax.random.normal(ks[10], (hidden_dims, output_dims), f32) * (1.0 / jnp.sqrt(hidden_dims))
    b2 = jax.random.normal(ks[11], (output_dims,), f32) * 0.01
    return (g1, be1, m1, v1, w1_t, b1, g2, be2, m2, v2, w2_t, b2)


def reference_forward(x, params):
    """Eval-mode module semantics, all f32 (dropout is identity in eval)."""
    (g1, be1, m1, v1, w1_t, b1, g2, be2, m2, v2, w2_t, b2) = params
    h = (x - m1) / jnp.sqrt(v1 + BN_EPS) * g1 + be1
    h = jnp.maximum(h @ w1_t + b1, 0.0)
    h = (h - m2) / jnp.sqrt(v2 + BN_EPS) * g2 + be2
    return h @ w2_t + b2


if __name__ == "__main__":
    # Small shapes consistent with the module (defaults 2048/2048/100, scaled
    # down).  output_dims=100 kept non-multiple-of-128 to exercise lane padding.
    batch = 32
    input_dims = 512
    hidden_dims = 512
    output_dims = 100

    key = jax.random.PRNGKey(0)
    kx, kp = jax.random.split(key)
    x = jax.random.normal(kx, (batch, input_dims), jnp.float32)
    params = make_params(kp, input_dims, hidden_dims, output_dims)

    # References: matched precision (bf16 operands, f32 accumulation) and
    # module-semantics f32 eval mode.
    w1f, b1f, w2f, b2f = fold_params(params)
    hb = jnp.dot(x.astype(jnp.bfloat16), w1f.astype(jnp.bfloat16),
                 preferred_element_type=jnp.float32) + b1f
    hb = jnp.maximum(hb, 0.0).astype(jnp.bfloat16)
    ref_bf16 = jnp.dot(hb, w2f.astype(jnp.bfloat16),
                       preferred_element_type=jnp.float32) + b2f
    ref_f32 = reference_forward(x, params)
    scale = jnp.max(jnp.abs(ref_f32))

    # 1) Default path: one batch tile, weights resident / single-buffered.
    out = jax.block_until_ready(devise_forward(x, params))
    assert out.shape == (batch, output_dims)
    assert jnp.allclose(out, ref_bf16, atol=2e-2, rtol=2e-2), \
        "mismatch vs matched-precision reference (default path)"
    assert jnp.max(jnp.abs(out - ref_f32)) <= 0.05 * scale + 1e-3, \
        "bf16 error too large (default path)"

    # 2) Streaming / multi-tile path: 2 batch tiles x 2 hidden chunks
    #    (exercises the resident-output accumulation and the parallel axis).
    out2 = jax.block_until_ready(devise_forward(x, params, tile_b=16, tile_h=256))
    assert out2.shape == (batch, output_dims)
    assert jnp.allclose(out2, ref_bf16, atol=2e-2, rtol=2e-2), \
        "mismatch vs matched-precision reference (streaming path)"
    assert jnp.max(jnp.abs(out2 - ref_f32)) <= 0.05 * scale + 1e-3, \
        "bf16 error too large (streaming path)"

    print("KERNEL_OK")
</pallas_src>

<mosaic_0001>
module attributes {stable_mosaic.version = 11 : i64} {
  func.func @_devise_kernel(%arg0: i32, %arg1: i32, %arg2: memref<32x512xf32, #tpu.memory_space<vmem>>, %arg3: memref<512x512xbf16, #tpu.memory_space<vmem>>, %arg4: memref<1x512xf32, #tpu.memory_space<vmem>>, %arg5: memref<512x128xbf16, #tpu.memory_space<vmem>>, %arg6: memref<1x128xf32, #tpu.memory_space<vmem>>, %arg7: memref<32x128xf32, #tpu.memory_space<vmem>>) attributes {dimension_semantics = [#tpu.dimension_semantics<parallel>, #tpu.dimension_semantics<arbitrary>], iteration_bounds = array<i64: 1, 1>, scalar_prefetch = 0 : i64, scratch_operands = 0 : i64, tpu.core_type = #tpu.core_type<tc>, window_params = [{transform_indices = @transform_0, window_bounds = array<i64: 32, 512>}, {pipeline_mode = #tpu.pipeline_mode<synchronous>, transform_indices = @transform_1, window_bounds = array<i64: 512, 512>}, {pipeline_mode = #tpu.pipeline_mode<synchronous>, transform_indices = @transform_2, window_bounds = array<i64: 1, 512>}, {pipeline_mode = #tpu.pipeline_mode<synchronous>, transform_indices = @transform_3, window_bounds = array<i64: 512, 128>}, {pipeline_mode = #tpu.pipeline_mode<synchronous>, transform_indices = @transform_4, window_bounds = array<i64: 1, 128>}, {transform_indices = @transform_5, window_bounds = array<i64: 32, 128>}]} {
    %c0_i32 = arith.constant 0 : i32
    %0 = arith.cmpi eq, %arg1, %c0_i32 : i32
    %1 = arith.extui %0 : i1 to i32
    %c0_i32_0 = arith.constant 0 : i32
    %2 = arith.cmpi ne, %1, %c0_i32_0 : i32
    scf.if %2 {
      %c0_14 = arith.constant 0 : index
      %c0_15 = arith.constant 0 : index
      %18 = vector.load %arg6[%c0_14, %c0_15] : memref<1x128xf32, #tpu.memory_space<vmem>>, vector<1x128xf32>
      %19 = vector.shape_cast %18 : vector<1x128xf32> to vector<1x128xf32>
      %20 = vector.broadcast %19 : vector<1x128xf32> to vector<32x128xf32>
      %c0_16 = arith.constant 0 : index
      %c0_17 = arith.constant 0 : index
      %21 = vector.load %arg7[%c0_16, %c0_17] : memref<32x128xf32, #tpu.memory_space<vmem>>, vector<32x128xf32>
      tpu.vector_store %arg7[%c0_16, %c0_17], %20 {strides = array<i32>} : memref<32x128xf32, #tpu.memory_space<vmem>>, vector<32x128xf32>,
    } else {
    }
    %c0 = arith.constant 0 : index
    %c0_1 = arith.constant 0 : index
    %3 = vector.load %arg2[%c0, %c0_1] : memref<32x512xf32, #tpu.memory_space<vmem>>, vector<32x512xf32>
    %4 = arith.truncf %3 : vector<32x512xf32> to vector<32x512xbf16>
    %c0_2 = arith.constant 0 : index
    %c0_3 = arith.constant 0 : index
    %5 = vector.load %arg3[%c0_2, %c0_3] : memref<512x512xbf16, #tpu.memory_space<vmem>>, vector<512x512xbf16>
    %cst = arith.constant dense<0.000000e+00> : vector<32x512xf32>
    %6 = tpu.matmul %4, %5, %cst {dimension_numbers = #tpu.dot_dimension_numbers<[1], [0], [0], [1], [0, 0, 1, 1], [], []>} : vector<32x512xbf16>, vector<512x512xbf16>, vector<32x512xf32> -> vector<32x512xf32>
    %c0_4 = arith.constant 0 : index
    %c0_5 = arith.constant 0 : index
    %7 = vector.load %arg4[%c0_4, %c0_5] : memref<1x512xf32, #tpu.memory_space<vmem>>, vector<1x512xf32>
    %8 = vector.broadcast %7 : vector<1x512xf32> to vector<32x512xf32>
    %9 = arith.addf %6, %8 : vector<32x512xf32>
    %cst_6 = arith.constant 0.000000e+00 : f32
    %10 = vector.broadcast %cst_6 : f32 to vector<32x512xf32>
    %11 = arith.maximumf %9, %10 : vector<32x512xf32>
    %c0_7 = arith.constant 0 : index
    %c0_8 = arith.constant 0 : index
    %12 = vector.load %arg7[%c0_7, %c0_8] : memref<32x128xf32, #tpu.memory_space<vmem>>, vector<32x128xf32>
    %13 = arith.truncf %11 : vector<32x512xf32> to vector<32x512xbf16>
    %c0_9 = arith.constant 0 : index
    %c0_10 = arith.constant 0 : index
    %14 = vector.load %arg5[%c0_9, %c0_10] : memref<512x128xbf16, #tpu.memory_space<vmem>>, vector<512x128xbf16>
    %cst_11 = arith.constant dense<0.000000e+00> : vector<32x128xf32>
    %15 = tpu.matmul %13, %14, %cst_11 {dimension_numbers = #tpu.dot_dimension_numbers<[1], [0], [0], [1], [0, 0, 1, 1], [], []>} : vector<32x512xbf16>, vector<512x128xbf16>, vector<32x128xf32> -> vector<32x128xf32>
    %16 = arith.addf %12, %15 : vector<32x128xf32>
    %c0_12 = arith.constant 0 : index
    %c0_13 = arith.constant 0 : index
    %17 = vector.load %arg7[%c0_12, %c0_13] : memref<32x128xf32, #tpu.memory_space<vmem>>, vector<32x128xf32>
    tpu.vector_store %arg7[%c0_12, %c0_13], %16 {strides = array<i32>} : memref<32x128xf32, #tpu.memory_space<vmem>>, vector<32x128xf32>,
    return
  }
  func.func @transform_0(%arg0: i32, %arg1: i32) -> (i32, i32) {
    %c0_i32 = arith.constant 0 : i32
    %c0_i32_0 = arith.constant 0 : i32
    return %arg0, %c0_i32 : i32, i32
  }
  func.func @transform_1(%arg0: i32, %arg1: i32) -> (i32, i32) {
    %c0_i32 = arith.constant 0 : i32
    %c0_i32_0 = arith.constant 0 : i32
    return %c0_i32, %arg1 : i32, i32
  }
  func.func @transform_2(%arg0: i32, %arg1: i32) -> (i32, i32) {
    %c0_i32 = arith.constant 0 : i32
    %c0_i32_0 = arith.constant 0 : i32
    return %c0_i32, %arg1 : i32, i32
  }
  func.func @transform_3(%arg0: i32, %arg1: i32) -> (i32, i32) {
    %c0_i32 = arith.constant 0 : i32
    %c0_i32_0 = arith.constant 0 : i32
    return %arg1, %c0_i32 : i32, i32
  }
  func.func @transform_4(%arg0: i32, %arg1: i32) -> (i32, i32) {
    %c0_i32 = arith.constant 0 : i32
    %c0_i32_0 = arith.constant 0 : i32
    %c0_i32_1 = arith.constant 0 : i32
    return %c0_i32, %c0_i32_0 : i32, i32
  }
  func.func @transform_5(%arg0: i32, %arg1: i32) -> (i32, i32) {
    %c0_i32 = arith.constant 0 : i32
    %c0_i32_0 = arith.constant 0 : i32
    return %arg0, %c0_i32 : i32, i32
  }
}

module attributes {stable_mosaic.version = 11 : i64} {
  func.func @_devise_kernel(%arg0: i32, %arg1: i32, %arg2: memref<32x512xf32, #tpu.memory_space<vmem>>, %arg3: memref<512x512xbf16, #tpu.memory_space<vmem>>, %arg4: memref<1x512xf32, #tpu.memory_space<vmem>>, %arg5: memref<512x128xbf16, #tpu.memory_space<vmem>>, %arg6: memref<1x128xf32, #tpu.memory_space<vmem>>, %arg7: memref<32x128xf32, #tpu.memory_space<vmem>>) attributes {dimension_semantics = [#tpu.dimension_semantics<parallel>, #tpu.dimension_semantics<arbitrary>], iteration_bounds = array<i64: 1, 1>, scalar_prefetch = 0 : i64, scratch_operands = 0 : i64, tpu.core_type = #tpu.core_type<tc>, window_params = [{transform_indices = @transform_0, window_bounds = array<i64: 32, 512>}, {transform_indices = @transform_1, window_bounds = array<i64: 512, 512>}, {transform_indices = @transform_2, window_bounds = array<i64: 1, 512>}, {transform_indices = @transform_3, window_bounds = array<i64: 512, 128>}, {pipeline_mode = #tpu.pipeline_mode<synchronous>, transform_indices = @transform_4, window_bounds = array<i64: 1, 128>}, {transform_indices = @transform_5, window_bounds = array<i64: 32, 128>}]} {
    %c0_i32 = arith.constant 0 : i32
    %0 = arith.cmpi eq, %arg1, %c0_i32 : i32
    %1 = arith.extui %0 : i1 to i32
    %c0_i32_0 = arith.constant 0 : i32
    %2 = arith.cmpi ne, %1, %c0_i32_0 : i32
    scf.if %2 {
      %c0_14 = arith.constant 0 : index
      %c0_15 = arith.constant 0 : index
      %18 = vector.load %arg6[%c0_14, %c0_15] : memref<1x128xf32, #tpu.memory_space<vmem>>, vector<1x128xf32>
      %19 = vector.shape_cast %18 : vector<1x128xf32> to vector<1x128xf32>
      %20 = vector.broadcast %19 : vector<1x128xf32> to vector<32x128xf32>
      %c0_16 = arith.constant 0 : index
      %c0_17 = arith.constant 0 : index
      %21 = vector.load %arg7[%c0_16, %c0_17] : memref<32x128xf32, #tpu.memory_space<vmem>>, vector<32x128xf32>
      tpu.vector_store %arg7[%c0_16, %c0_17], %20 {strides = array<i32>} : memref<32x128xf32, #tpu.memory_space<vmem>>, vector<32x128xf32>,
    } else {
    }
    %c0 = arith.constant 0 : index
    %c0_1 = arith.constant 0 : index
    %3 = vector.load %arg2[%c0, %c0_1] : memref<32x512xf32, #tpu.memory_space<vmem>>, vector<32x512xf32>
    %4 = arith.truncf %3 : vector<32x512xf32> to vector<32x512xbf16>
    %c0_2 = arith.constant 0 : index
    %c0_3 = arith.constant 0 : index
    %5 = vector.load %arg3[%c0_2, %c0_3] : memref<512x512xbf16, #tpu.memory_space<vmem>>, vector<512x512xbf16>
    %cst = arith.constant dense<0.000000e+00> : vector<32x512xf32>
    %6 = tpu.matmul %4, %5, %cst {dimension_numbers = #tpu.dot_dimension_numbers<[1], [0], [0], [1], [0, 0, 1, 1], [], []>} : vector<32x512xbf16>, vector<512x512xbf16>, vector<32x512xf32> -> vector<32x512xf32>
    %c0_4 = arith.constant 0 : index
    %c0_5 = arith.constant 0 : index
    %7 = vector.load %arg4[%c0_4, %c0_5] : memref<1x512xf32, #tpu.memory_space<vmem>>, vector<1x512xf32>
    %8 = vector.broadcast %7 : vector<1x512xf32> to vector<32x512xf32>
    %9 = arith.addf %6, %8 : vector<32x512xf32>
    %cst_6 = arith.constant 0.000000e+00 : f32
    %10 = vector.broadcast %cst_6 : f32 to vector<32x512xf32>
    %11 = arith.maximumf %9, %10 : vector<32x512xf32>
    %c0_7 = arith.constant 0 : index
    %c0_8 = arith.constant 0 : index
    %12 = vector.load %arg7[%c0_7, %c0_8] : memref<32x128xf32, #tpu.memory_space<vmem>>, vector<32x128xf32>
    %13 = arith.truncf %11 : vector<32x512xf32> to vector<32x512xbf16>
    %c0_9 = arith.constant 0 : index
    %c0_10 = arith.constant 0 : index
    %14 = vector.load %arg5[%c0_9, %c0_10] : memref<512x128xbf16, #tpu.memory_space<vmem>>, vector<512x128xbf16>
    %cst_11 = arith.constant dense<0.000000e+00> : vector<32x128xf32>
    %15 = tpu.matmul %13, %14, %cst_11 {dimension_numbers = #tpu.dot_dimension_numbers<[1], [0], [0], [1], [0, 0, 1, 1], [], []>} : vector<32x512xbf16>, vector<512x128xbf16>, vector<32x128xf32> -> vector<32x128xf32>
    %16 = arith.addf %12, %15 : vector<32x128xf32>
    %c0_12 = arith.constant 0 : index
    %c0_13 = arith.constant 0 : index
    %17 = vector.load %arg7[%c0_12, %c0_13] : memref<32x128xf32, #tpu.memory_space<vmem>>, vector<32x128xf32>
    tpu.vector_store %arg7[%c0_12, %c0_13], %16 {strides = array<i32>} : memref<32x128xf32, #tpu.memory_space<vmem>>, vector<32x128xf32>,
    return
  }
  func.func @transform_0(%arg0: i32, %arg1: i32) -> (i32, i32) {
    %c0_i32 = arith.constant 0 : i32
    %c0_i32_0 = arith.constant 0 : i32
    return %arg0, %c0_i32 : i32, i32
  }
  func.func @transform_1(%arg0: i32, %arg1: i32) -> (i32, i32) {
    %c0_i32 = arith.constant 0 : i32
    %c0_i32_0 = arith.constant 0 : i32
    return %c0_i32, %arg1 : i32, i32
  }
  func.func @transform_2(%arg0: i32, %arg1: i32) -> (i32, i32) {
    %c0_i32 = arith.constant 0 : i32
    %c0_i32_0 = arith.constant 0 : i32
    return %c0_i32, %arg1 : i32, i32
  }
  func.func @transform_3(%arg0: i32, %arg1: i32) -> (i32, i32) {
    %c0_i32 = arith.constant 0 : i32
    %c0_i32_0 = arith.constant 0 : i32
    return %arg1, %c0_i32 : i32, i32
  }
  func.func @transform_4(%arg0: i32, %arg1: i32) -> (i32, i32) {
    %c0_i32 = arith.constant 0 : i32
    %c0_i32_0 = arith.constant 0 : i32
    %c0_i32_1 = arith.constant 0 : i32
    return %c0_i32, %c0_i32_0 : i32, i32
  }
  func.func @transform_5(%arg0: i32, %arg1: i32) -> (i32, i32) {
    %c0_i32 = arith.constant 0 : i32
    %c0_i32_0 = arith.constant 0 : i32
    return %arg0, %c0_i32 : i32, i32
  }
}

</mosaic_0001>

<bundles_post_ra>
// kernel: tpu_custom_call.1
= control target key start
LH: loop header
LB: loop body
LE: loop exit
PB: predicated region body
PF: predicated region fallthrough
CT: control target
= control target key end

     0   :  { %10 = vsyncpa [#allocation3], 0  ;;  %s2187_s0 = inlined_call_operand.hbm [shape: f32[32,512], index: 0, kind: input, shape index: {}]   ;;  %s2188_s1 = inlined_call_operand.hbm [shape: bf16[512,512], index: 1, kind: input, shape index: {}]   ;;  %s2189_s2 = inlined_call_operand.vmem [shape: f32[1,512], index: 2, kind: input, shape index: {}]   ;;  %s2190_s3 = inlined_call_operand.hbm [shape: bf16[512,128], index: 3, kind: input, shape index: {}]   ;;  %s2191_s4 = inlined_call_operand.vmem [shape: f32[1,128], index: 4, kind: input, shape index: {}]   ;;  %s2192_s5 = inlined_call_operand.hbm [shape: f32[32,128], index: 5, kind: output, shape index: {}]  }
   0x1   :  { %11 = vsyncpa [#allocation6], 0 }
   0x2   :  { %12 = vsyncpa [#allocation4], 0  ;;  %s2091_s18 = smov [#allocation5]   ;;  %s1997_s22 = scalar_lea.hbm %s2188_s1, 16384 }
   0x3   :  { %s30_s19 = sshll.u32 %s2091_s18, 4  ;;  %p1998_p0 = scmp.ne.s32.totalorder %s2188_s1, %s1997_s22  ;;  %s31_s19 = int_to_ptr.vmem [resolvable:$true] %s30_s19 }
   0x4   :  { %p2001_p1 = scmp.lt.u32.totalorder %s1997_s22, %s2188_s1 }
   0x6   :  { %p2003_p2 = pnand %p2001_p1, %p1998_p0 }
   0x8   :  { %2006 = shalt.err (!%p2003_p2)
}
   0x9   :  { %s2007_s27 = scalar_lea.vmem %s31_s19, 16384  ;;  %p2012_p4 = scmp.lt.s32.totalorder %s31_s19, %s31_s19 }
   0xa   :  { %p2008_p3 = scmp.ne.s32.totalorder %s31_s19, %s2007_s27  ;;  %p2013_p5 = scmp.lt.s32.totalorder %s2007_s27, %s2007_s27 }
   0xc   :  { %p2014_p6 = por %p2013_p5, %p2012_p4 }
   0xe   :  { %p2015_p7 = pnand %p2014_p6, %p2008_p3 }
  0x10   :  { %2018 = shalt.err (!%p2015_p7)
}
  0x11   :  { %s2092_s28 = smov 256   ;;  %s2093_s29 = smov 16  }
  0x12   :  { %36 = dma.hbm_to_vmem [thread:$0]  %s2188_s1, 16384, %s31_s19, [#allocation6], %s2092_s28, %s2092_s28, %s2093_s29  }
  0x13   :  { %s2094_s7 = smov [#allocation2]   ;;  %s2019_s11 = scalar_lea.hbm %s2187_s0, 2048 }
  0x14   :  { %s18_s8 = sshll.u32 %s2094_s7, 4  ;;  %p2020_p8 = scmp.ne.s32.totalorder %s2187_s0, %s2019_s11  ;;  %s19_s8 = int_to_ptr.vmem [resolvable:$true] %s18_s8 }
  0x15   :  { %p2023_p9 = scmp.lt.u32.totalorder %s2019_s11, %s2187_s0 }
  0x17   :  { %p2025_p10 = pnand %p2023_p9, %p2020_p8 }
  0x19   :  { %2028 = shalt.err (!%p2025_p10)
}
  0x1a   :  { %s2029_s16 = scalar_lea.vmem %s19_s8, 2048  ;;  %p2034_p12 = scmp.lt.s32.totalorder %s19_s8, %s19_s8 }
  0x1b   :  { %p2030_p11 = scmp.ne.s32.totalorder %s19_s8, %s2029_s16  ;;  %p2035_p13 = scmp.lt.s32.totalorder %s2029_s16, %s2029_s16 }
  0x1d   :  { %p2036_p0 = por %p2035_p13, %p2034_p12 }
  0x1f   :  { %p2037_p1 = pnand %p2036_p0, %p2030_p11 }
  0x21   :  { %2040 = shalt.err (!%p2037_p1)
}
  0x22   :  { %s2095_s1 = smov 512   ;;  %s2096_s17 = smov 32  }
  0x23   :  { %24 = dma.hbm_to_vmem [thread:$0]  %s2187_s0, 2048, %s19_s8, [#allocation3], %s2095_s1, %s2095_s1, %s2096_s17  }
  0x24   :  { %s2097_s20 = smov [#allocation7]   ;;  %s2041_s24 = scalar_lea.hbm %s2190_s3, 4096 }
  0x25   :  { %s44_s21 = sshll.u32 %s2097_s20, 4  ;;  %p2042_p2 = scmp.ne.s32.totalorder %s2190_s3, %s2041_s24  ;;  %s45_s21 = int_to_ptr.vmem [resolvable:$true] %s44_s21 }
  0x26   :  { %p2045_p3 = scmp.lt.u32.totalorder %s2041_s24, %s2190_s3 }
  0x28   :  { %p2047_p4 = pnand %p2045_p3, %p2042_p2 }
  0x2a   :  { %2050 = shalt.err (!%p2047_p4)
}
  0x2b   :  { %s2051_s29 = scalar_lea.vmem %s45_s21, 4096  ;;  %p2056_p6 = scmp.lt.s32.totalorder %s45_s21, %s45_s21 }
  0x2c   :  { %p2052_p5 = scmp.ne.s32.totalorder %s45_s21, %s2051_s29  ;;  %p2057_p7 = scmp.lt.s32.totalorder %s2051_s29, %s2051_s29 }
  0x2e   :  { %p2058_p8 = por %p2057_p7, %p2056_p6 }
  0x30   :  { %p2059_p9 = pnand %p2058_p8, %p2052_p5 }
  0x32   :  { %2062 = shalt.err (!%p2059_p9)
}
  0x33   :  { %s2098_s0 = smov 64   ;;  %s2099_s30 = smov 4  }
  0x34   :  { %50 = dma.hbm_to_vmem [thread:$0]  %s2190_s3, 4096, %s45_s21, [#allocation6], %s2098_s0, %s2098_s0, %s2099_s30  }
  0x35   :  { %2085 = dma.done.wait [#allocation3], 2048  }
  0x36   :  { %2086 = vsyncadd [#allocation3], 4294965248 }
  0x37   :  { %2087 = dma.done.wait [#allocation6], 20480  }
  0x38   :  { %2088 = vsyncadd [#allocation6], 4294946816  ;;  %v1773_v0 = vld [vmem:[#allocation5 + $0x4] ss:$16 sps:$4 sm:$0xff]   ;;  %v1775_v1 = vld [vmem:[#allocation5 + $0xc] ss:$16 sps:$4 sm:$0xff]  }
  0x39   :  { %892 = vmatprep.subr.bf16.mxu0 %v1773_v0  ;;  %v1777_v2 = vld [vmem:[#allocation5] ss:$16 sps:$4 sm:$0xff]   ;;  %v1778_v3 = vld [vmem:[#allocation5 + $0x8] ss:$16 sps:$4 sm:$0xff]   ;;  %998 = vmatprep.subr.bf16.mxu1 %v1775_v1  ;;  %v1779_v4 = vld [vmem:[#allocation5 + $0x24] ss:$16 sps:$4 sm:$0xff]  }
  0x3a   :  { %893 = vmatpush1.bf16.msra.mxu0 %v1777_v2  ;;  %999 = vmatpush1.bf16.msra.mxu1 %v1778_v3  ;;  %v1781_v5 = vld [vmem:[#allocation5 + $0x2c] ss:$16 sps:$4 sm:$0xff]   ;;  %v1783_v6 = vld [vmem:[#allocation5 + $0x20] ss:$16 sps:$4 sm:$0xff]   ;;  %v1784_v7 = vld [vmem:[#allocation5 + $0x28] ss:$16 sps:$4 sm:$0xff]  }
  0x3b   :  { %894 = vmatprep.subr.bf16.mxu0 %v1779_v4  ;;  %1000 = vmatprep.subr.bf16.mxu1 %v1781_v5  ;;  %v1785_v8 = vld [vmem:[#allocation5 + $0x44] ss:$16 sps:$4 sm:$0xff]   ;;  %v1787_v9 = vld [vmem:[#allocation5 + $0x4c] ss:$16 sps:$4 sm:$0xff]   ;;  %v1789_v10 = vld [vmem:[#allocation5 + $0x40] ss:$16 sps:$4 sm:$0xff]  }
  0x3c   :  { %v1790_v11 = vld [vmem:[#allocation5 + $0x48] ss:$16 sps:$4 sm:$0xff]   ;;  %v1791_v12 = vld [vmem:[#allocation5 + $0x64] ss:$16 sps:$4 sm:$0xff]   ;;  %v1793_v13 = vld [vmem:[#allocation5 + $0x6c] ss:$16 sps:$4 sm:$0xff]  }
  0x3d   :  { %v1795_v14 = vld [vmem:[#allocation5 + $0x60] ss:$16 sps:$4 sm:$0xff]   ;;  %v1796_v15 = vld [vmem:[#allocation5 + $0x68] ss:$16 sps:$4 sm:$0xff]   ;;  %v1797_v16 = vld [vmem:[#allocation5 + $0x84] ss:$16 sps:$4 sm:$0xff]  }
  0x3e   :  { %895 = vmatpush1.bf16.msra.mxu0 %v1783_v6  ;;  %1001 = vmatpush1.bf16.msra.mxu1 %v1784_v7  ;;  %v1799_v17 = vld [vmem:[#allocation5 + $0x8c] ss:$16 sps:$4 sm:$0xff]   ;;  %v1801_v18 = vld [vmem:[#allocation5 + $0x80] ss:$16 sps:$4 sm:$0xff]   ;;  %v1802_v19 = vld [vmem:[#allocation5 + $0x88] ss:$16 sps:$4 sm:$0xff]  }
  0x3f   :  { %896 = vmatprep.subr.bf16.mxu0 %v1785_v8  ;;  %1002 = vmatprep.subr.bf16.mxu1 %v1787_v9  ;;  %v1803_v20 = vld [vmem:[#allocation5 + $0xa4] ss:$16 sps:$4 sm:$0xff]   ;;  %v1805_v21 = vld [vmem:[#allocation5 + $0xac] ss:$16 sps:$4 sm:$0xff]   ;;  %v1807_v22 = vld [vmem:[#allocation5 + $0xa0] ss:$16 sps:$4 sm:$0xff]  }
  0x40   :  { %v1808_v23 = vld [vmem:[#allocation5 + $0xa8] ss:$16 sps:$4 sm:$0xff]   ;;  %v1809_v24 = vld [vmem:[#allocation5 + $0xc4] ss:$16 sps:$4 sm:$0xff]   ;;  %v1811_v25 = vld [vmem:[#allocation5 + $0xcc] ss:$16 sps:$4 sm:$0xff]  }
  0x41   :  { %v1813_v26 = vld [vmem:[#allocation5 + $0xc0] ss:$16 sps:$4 sm:$0xff]   ;;  %v1814_v27 = vld [vmem:[#allocation5 + $0xc8] ss:$16 sps:$4 sm:$0xff]   ;;  %v1815_v28 = vld [vmem:[#allocation5 + $0xe4] ss:$16 sps:$4 sm:$0xff]  }
  0x42   :  { %897 = vmatpush1.bf16.msra.mxu0 %v1789_v10  ;;  %1003 = vmatpush1.bf16.msra.mxu1 %v1790_v11  ;;  %v1817_v29 = vld [vmem:[#allocation5 + $0xec] ss:$16 sps:$4 sm:$0xff]   ;;  %v1819_v30 = vld [vmem:[#allocation5 + $0xe0] ss:$16 sps:$4 sm:$0xff]   ;;  %v1820_v31 = vld [vmem:[#allocation5 + $0xe8] ss:$16 sps:$4 sm:$0xff]  }
  0x43   :  { %898 = vmatprep.subr.bf16.mxu0 %v1791_v12  ;;  %1004 = vmatprep.subr.bf16.mxu1 %v1793_v13  ;;  %v1821_v32 = vld [vmem:[#allocation5 + $0x104] ss:$16 sps:$4 sm:$0xff]   ;;  %v1823_v33 = vld [vmem:[#allocation5 + $0x10c] ss:$16 sps:$4 sm:$0xff]   ;;  %v1825_v34 = vld [vmem:[#allocation5 + $0x100] ss:$16 sps:$4 sm:$0xff]  }
  0x44   :  { %v1826_v35 = vld [vmem:[#allocation5 + $0x108] ss:$16 sps:$4 sm:$0xff]   ;;  %v1827_v36 = vld [vmem:[#allocation5 + $0x124] ss:$16 sps:$4 sm:$0xff]   ;;  %v1829_v37 = vld [vmem:[#allocation5 + $0x12c] ss:$16 sps:$4 sm:$0xff]  }
  0x45   :  { %v1831_v38 = vld [vmem:[#allocation5 + $0x120] ss:$16 sps:$4 sm:$0xff]   ;;  %v1832_v39 = vld [vmem:[#allocation5 + $0x128] ss:$16 sps:$4 sm:$0xff]   ;;  %v1833_v40 = vld [vmem:[#allocation5 + $0x144] ss:$16 sps:$4 sm:$0xff]  }
  0x46   :  { %899 = vmatpush1.bf16.msra.mxu0 %v1795_v14  ;;  %1005 = vmatpush1.bf16.msra.mxu1 %v1796_v15  ;;  %v1835_v41 = vld [vmem:[#allocation5 + $0x14c] ss:$16 sps:$4 sm:$0xff]   ;;  %v1837_v42 = vld [vmem:[#allocation5 + $0x140] ss:$16 sps:$4 sm:$0xff]   ;;  %v1838_v43 = vld [vmem:[#allocation5 + $0x148] ss:$16 sps:$4 sm:$0xff]  }
  0x47   :  { %900 = vmatprep.subr.bf16.mxu0 %v1797_v16  ;;  %1006 = vmatprep.subr.bf16.mxu1 %v1799_v17  ;;  %v1839_v44 = vld [vmem:[#allocation5 + $0x164] ss:$16 sps:$4 sm:$0xff]   ;;  %v1841_v45 = vld [vmem:[#allocation5 + $0x16c] ss:$16 sps:$4 sm:$0xff]   ;;  %v1843_v48 = vld [vmem:[#allocation5 + $0x160] ss:$16 sps:$4 sm:$0xff]  }
  0x48   :  { %v79_v46 = vld [vmem:[#allocation2 + $0x8] sm:$0xff]  ;;  %v1845_v51 = vld [vmem:[#allocation5 + $0x184] ss:$16 sps:$4 sm:$0xff]   ;;  %v1849_v53 = vld [vmem:[#allocation5 + $0x180] ss:$16 sps:$4 sm:$0xff]  }
  0x49   :  { %v83_v47 = vld [vmem:[#allocation2 + $0x28] sm:$0xff]  ;;  %v1851_v55 = vld [vmem:[#allocation5 + $0x1a4] ss:$16 sps:$4 sm:$0xff]   ;;  %v1855_v57 = vld [vmem:[#allocation5 + $0x1a0] ss:$16 sps:$4 sm:$0xff]  }
  0x4a   :  { %901 = vmatpush1.bf16.msra.mxu0 %v1801_v18  ;;  %1007 = vmatpush1.bf16.msra.mxu1 %v1802_v19  ;;  %v1844_v49 = vld [vmem:[#allocation5 + $0x168] ss:$16 sps:$4 sm:$0xff]   ;;  %v95_v50 = vpack.c.bf16 %v83_v47, %v79_v46  ;;  %v1847_v52 = vld [vmem:[#allocation5 + $0x18c] ss:$16 sps:$4 sm:$0xff]   ;;  %v1857_v59 = vld [vmem:[#allocation5 + $0x1c4] ss:$16 sps:$4 sm:$0xff]  }
  0x4b   :  { %902 = vmatprep.subr.bf16.mxu0 %v1803_v20  ;;  %1008 = vmatprep.subr.bf16.mxu1 %v1805_v21  ;;  %v1850_v54 = vld [vmem:[#allocation5 + $0x188] ss:$16 sps:$4 sm:$0xff]   ;;  %v1853_v56 = vld [vmem:[#allocation5 + $0x1ac] ss:$16 sps:$4 sm:$0xff]   ;;  %v1861_v61 = vld [vmem:[#allocation5 + $0x1c0] ss:$16 sps:$4 sm:$0xff]  }
  0x4c   :  { %924 = vmatprep.mubr.bf16.mxu0 %v95_v50  ;;  %1030 = vmatprep.mubr.bf16.mxu1 %v95_v50  ;;  %v1856_v58 = vld [vmem:[#allocation5 + $0x1a8] ss:$16 sps:$4 sm:$0xff]   ;;  %v1859_v60 = vld [vmem:[#allocation5 + $0x1cc] ss:$16 sps:$4 sm:$0xff]   ;;  %v1863_v63 = vld [vmem:[#allocation5 + $0x1e4] ss:$16 sps:$4 sm:$0xff]  }
  0x4d   :  { %v1862_v62 = vld [vmem:[#allocation5 + $0x1c8] ss:$16 sps:$4 sm:$0xff]   ;;  %v1865_v0 = vld [vmem:[#allocation5 + $0x1ec] ss:$16 sps:$4 sm:$0xff]   ;;  %v1867_v1 = vld [vmem:[#allocation5 + $0x1e0] ss:$16 sps:$4 sm:$0xff]  }
  0x4e   :  { %903 = vmatpush1.bf16.msra.mxu0 %v1807_v22  ;;  %1009 = vmatpush1.bf16.msra.mxu1 %v1808_v23  ;;  %v1868_v2 = vld [vmem:[#allocation5 + $0x1e8] ss:$16 sps:$4 sm:$0xff]   ;;  %v1871_v3 = vld [vmem:[#allocation5 + $0x204] ss:$16 sps:$4 sm:$0xff]   ;;  %v1874_v6 = vld [vmem:[#allocation5 + $0x20c] ss:$16 sps:$4 sm:$0xff]  }
  0x4f   :  { %904 = vmatprep.subr.bf16.mxu0 %v1809_v24  ;;  %1010 = vmatprep.subr.bf16.mxu1 %v1811_v25  ;;  %v78_v4 = vld [vmem:[#allocation2] sm:$0xff]  ;;  %v1872_v8 = vld [vmem:[#allocation5 + $0x208] ss:$16 sps:$4 sm:$0xff]   ;;  %v1880_v11 = vld [vmem:[#allocation5 + $0x22c] ss:$16 sps:$4 sm:$0xff]  }
  0x50   :  { %v82_v5 = vld [vmem:[#allocation2 + $0x20] sm:$0xff]  ;;  %v1878_v13 = vld [vmem:[#allocation5 + $0x228] ss:$16 sps:$4 sm:$0xff]   ;;  %v1886_v15 = vld [vmem:[#allocation5 + $0x24c] ss:$16 sps:$4 sm:$0xff]  }
  0x51   :  { %v1869_v7 = vld [vmem:[#allocation5 + $0x200] ss:$16 sps:$4 sm:$0xff]   ;;  %v94_v9 = vpack.c.bf16 %v82_v5, %v78_v4  ;;  %v1877_v10 = vld [vmem:[#allocation5 + $0x224] ss:$16 sps:$4 sm:$0xff]   ;;  %v1884_v17 = vld [vmem:[#allocation5 + $0x248] ss:$16 sps:$4 sm:$0xff]  }
  0x52   :  { %905 = vmatpush1.bf16.msra.mxu0 %v1813_v26  ;;  %1011 = vmatpush1.bf16.msra.mxu1 %v1814_v27  ;;  %v1875_v12 = vld [vmem:[#allocation5 + $0x220] ss:$16 sps:$4 sm:$0xff]   ;;  %v1883_v14 = vld [vmem:[#allocation5 + $0x244] ss:$16 sps:$4 sm:$0xff]   ;;  %v1892_v19 = vld [vmem:[#allocation5 + $0x26c] ss:$16 sps:$4 sm:$0xff]  }
  0x53   :  { %906 = vmatprep.subr.bf16.mxu0 %v1815_v28  ;;  %1012 = vmatprep.subr.bf16.mxu1 %v1817_v29  ;;  %v1881_v16 = vld [vmem:[#allocation5 + $0x240] ss:$16 sps:$4 sm:$0xff]   ;;  %v1889_v18 = vld [vmem:[#allocation5 + $0x264] ss:$16 sps:$4 sm:$0xff]   ;;  %v1890_v21 = vld [vmem:[#allocation5 + $0x268] ss:$16 sps:$4 sm:$0xff]  }
  0x54   :  { %v1887_v20 = vld [vmem:[#allocation5 + $0x260] ss:$16 sps:$4 sm:$0xff]   ;;  %v1895_v22 = vld [vmem:[#allocation5 + $0x284] ss:$16 sps:$4 sm:$0xff]   ;;  %v1898_v23 = vld [vmem:[#allocation5 + $0x28c] ss:$16 sps:$4 sm:$0xff]  }
  0x55   :  { %v1893_v24 = vld [vmem:[#allocation5 + $0x280] ss:$16 sps:$4 sm:$0xff]   ;;  %v1896_v25 = vld [vmem:[#allocation5 + $0x288] ss:$16 sps:$4 sm:$0xff]   ;;  %v1901_v26 = vld [vmem:[#allocation5 + $0x2a4] ss:$16 sps:$4 sm:$0xff]  }
  0x56   :  { %907 = vmatpush1.bf16.msra.mxu0 %v1819_v30  ;;  %1013 = vmatpush1.bf16.msra.mxu1 %v1820_v31  ;;  %v1904_v27 = vld [vmem:[#allocation5 + $0x2ac] ss:$16 sps:$4 sm:$0xff]   ;;  %v86_v31 = vld [vmem:[#allocation2 + $0x40] sm:$0xff]  ;;  %v1914_v46 = vld [vmem:[#allocation5 + $0x2e8] ss:$16 sps:$4 sm:$0xff]  }
  0x57   :  { %908 = vmatprep.subr.bf16.mxu0 %v1821_v32  ;;  %1014 = vmatprep.subr.bf16.mxu1 %v1823_v33  ;;  %v87_v28 = vld [vmem:[#allocation2 + $0x48] sm:$0xff]  ;;  %v90_v32 = vld [vmem:[#allocation2 + $0x60] sm:$0xff] }
  0x58   :  { %v91_v29 = vld [vmem:[#allocation2 + $0x68] sm:$0xff]  ;;  %v1899_v33 = vld [vmem:[#allocation5 + $0x2a0] ss:$16 sps:$4 sm:$0xff]   ;;  %v1919_v47 = vld [vmem:[#allocation5 + $0x304] ss:$16 sps:$4 sm:$0xff]  }
  0x59   :  { %v99_v30 = vpack.c.bf16 %v91_v29, %v87_v28  ;;  %v1920_v50 = vld [vmem:[#allocation5 + $0x308] ss:$16 sps:$4 sm:$0xff]   ;;  %v1952_v4 = vld [vmem:[#allocation5 + $0x3ac] ss:$16 sps:$4 sm:$0xff]   ;;  %v1947_v5 = vld [vmem:[#allocation5 + $0x3a0] ss:$16 sps:$4 sm:$0xff]  }
  0x5a   :  { %909 = vmatpush1.bf16.msra.mxu0 %v1825_v34  ;;  %1015 = vmatpush1.bf16.msra.mxu1 %v1826_v35  ;;  %v1902_v34 = vld [vmem:[#allocation5 + $0x2a8] ss:$16 sps:$4 sm:$0xff]   ;;  %v98_v35 = vpack.c.bf16 %v90_v32, %v86_v31  ;;  %v92_v28 = vld [vmem:[#allocation2 + $0x70] sm:$0xff] }
  0x5b   :  { %910 = vmatprep.subr.bf16.mxu0 %v1827_v36  ;;  %1016 = vmatprep.subr.bf16.mxu1 %v1829_v37  ;;  %v1907_v36 = vld [vmem:[#allocation5 + $0x2c4] ss:$16 sps:$4 sm:$0xff]   ;;  %v1910_v37 = vld [vmem:[#allocation5 + $0x2cc] ss:$16 sps:$4 sm:$0xff]  }
  0x5c   :  { %v1971_v29 = vld [vmem:[#allocation7 + $0x8] sm:$0xff]   ;;  %v1973_v31 = vld [vmem:[#allocation7 + $0x50] sm:$0xff]  }
  0x5d   :  { %v1974_v32 = vld [vmem:[#allocation7 + $0xd0] sm:$0xff]  }
  0x5e   :  { %911 = vmatpush1.bf16.msra.mxu0 %v1831_v38  ;;  %1017 = vmatpush1.bf16.msra.mxu1 %v1832_v39  ;;  %v1905_v38 = vld [vmem:[#allocation5 + $0x2c0] ss:$16 sps:$4 sm:$0xff]   ;;  %v1908_v39 = vld [vmem:[#allocation5 + $0x2c8] ss:$16 sps:$4 sm:$0xff]  }
  0x5f   :  { %912 = vmatprep.subr.bf16.mxu0 %v1833_v40  ;;  %1018 = vmatprep.subr.bf16.mxu1 %v1835_v41  ;;  %v81_v40 = vld [vmem:[#allocation2 + $0x18] sm:$0xff] }
  0x60   :  { %v85_v41 = vld [vmem:[#allocation2 + $0x38] sm:$0xff] }
  0x62   :  { %913 = vmatpush1.bf16.msra.mxu0 %v1837_v42  ;;  %1019 = vmatpush1.bf16.msra.mxu1 %v1838_v43  ;;  %v1913_v42 = vld [vmem:[#allocation5 + $0x2e4] ss:$16 sps:$4 sm:$0xff]   ;;  %v1916_v43 = vld [vmem:[#allocation5 + $0x2ec] ss:$16 sps:$4 sm:$0xff]  }
  0x63   :  { %914 = vmatprep.subr.bf16.mxu0 %v1839_v44  ;;  %1020 = vmatprep.subr.bf16.mxu1 %v1841_v45  ;;  %v97_v44 = vpack.c.bf16 %v85_v41, %v81_v40  ;;  %v1911_v45 = vld [vmem:[#allocation5 + $0x2e0] ss:$16 sps:$4 sm:$0xff]  }
  0x64   :  { %v1981_v40 = vld [vmem:[#allocation7 + $0x60] sm:$0xff]  }
  0x65   :  { %v1982_v41 = vld [vmem:[#allocation7 + $0xe0] sm:$0xff]  }
  0x66   :  { %915 = vmatpush1.bf16.msra.mxu0 %v1843_v48  ;;  %1021 = vmatpush1.bf16.msra.mxu1 %v1844_v49  ;;  %v1922_v48 = vld [vmem:[#allocation5 + $0x30c] ss:$16 sps:$4 sm:$0xff]   ;;  %v1917_v49 = vld [vmem:[#allocation5 + $0x300] ss:$16 sps:$4 sm:$0xff]  }
  0x67   :  { %916 = vmatprep.subr.bf16.mxu0 %v1845_v51  ;;  %1022 = vmatprep.subr.bf16.mxu1 %v1847_v52  ;;  %v1925_v51 = vld [vmem:[#allocation5 + $0x324] ss:$16 sps:$4 sm:$0xff]   ;;  %v1928_v52 = vld [vmem:[#allocation5 + $0x32c] ss:$16 sps:$4 sm:$0xff]  }
  0x6a   :  { %917 = vmatpush1.bf16.msra.mxu0 %v1849_v53  ;;  %1023 = vmatpush1.bf16.msra.mxu1 %v1850_v54  ;;  %v1923_v53 = vld [vmem:[#allocation5 + $0x320] ss:$16 sps:$4 sm:$0xff]   ;;  %v1926_v54 = vld [vmem:[#allocation5 + $0x328] ss:$16 sps:$4 sm:$0xff]  }
  0x6b   :  { %918 = vmatprep.subr.bf16.mxu0 %v1851_v55  ;;  %1024 = vmatprep.subr.bf16.mxu1 %v1853_v56  ;;  %v1931_v55 = vld [vmem:[#allocation5 + $0x344] ss:$16 sps:$4 sm:$0xff]   ;;  %v1934_v56 = vld [vmem:[#allocation5 + $0x34c] ss:$16 sps:$4 sm:$0xff]  }
  0x6e   :  { %919 = vmatpush1.bf16.msra.mxu0 %v1855_v57  ;;  %1025 = vmatpush1.bf16.msra.mxu1 %v1856_v58  ;;  %v1929_v57 = vld [vmem:[#allocation5 + $0x340] ss:$16 sps:$4 sm:$0xff]   ;;  %v1932_v58 = vld [vmem:[#allocation5 + $0x348] ss:$16 sps:$4 sm:$0xff]  }
  0x6f   :  { %920 = vmatprep.subr.bf16.mxu0 %v1857_v59  ;;  %1026 = vmatprep.subr.bf16.mxu1 %v1859_v60  ;;  %v1937_v59 = vld [vmem:[#allocation5 + $0x364] ss:$16 sps:$4 sm:$0xff]   ;;  %v1940_v60 = vld [vmem:[#allocation5 + $0x36c] ss:$16 sps:$4 sm:$0xff]  }
  0x72   :  { %921 = vmatpush1.bf16.msra.mxu0 %v1861_v61  ;;  %1027 = vmatpush1.bf16.msra.mxu1 %v1862_v62  ;;  %v1935_v61 = vld [vmem:[#allocation5 + $0x360] ss:$16 sps:$4 sm:$0xff]   ;;  %v1938_v62 = vld [vmem:[#allocation5 + $0x368] ss:$16 sps:$4 sm:$0xff]  }
  0x73   :  { %922 = vmatprep.subr.bf16.mxu0 %v1863_v63  ;;  %1028 = vmatprep.subr.bf16.mxu1 %v1865_v0  ;;  %v1943_v63 = vld [vmem:[#allocation5 + $0x384] ss:$16 sps:$4 sm:$0xff]   ;;  %v1946_v0 = vld [vmem:[#allocation5 + $0x38c] ss:$16 sps:$4 sm:$0xff]  }
  0x76   :  { %923 = vmatpush1.bf16.msra.mxu0 %v1867_v1  ;;  %1029 = vmatpush1.bf16.msra.mxu1 %v1868_v2  ;;  %v1941_v1 = vld [vmem:[#allocation5 + $0x380] ss:$16 sps:$4 sm:$0xff]   ;;  %v1944_v2 = vld [vmem:[#allocation5 + $0x388] ss:$16 sps:$4 sm:$0xff]  }
  0x77   :  { %945 = vmatprep.subr.bf16.mxu0 %v1871_v3  ;;  %1051 = vmatprep.subr.bf16.mxu1 %v1874_v6  ;;  %v1949_v3 = vld [vmem:[#allocation5 + $0x3a4] ss:$16 sps:$4 sm:$0xff]   ;;  %v1950_v6 = vld [vmem:[#allocation5 + $0x3a8] ss:$16 sps:$4 sm:$0xff]  }
  0x79   :  { %925 = vmatmul.mubr.bf16.vlgmr.msra.gmra.mrb[0].mxu0 %v94_v9  ;;  %1031 = vmatmul.mubr.bf16.vlgmr.msra.gmra.mrb[0].mxu1 %v94_v9  ;;  %v1953_v9 = vld [vmem:[#allocation5 + $0x3c0] ss:$16 sps:$4 sm:$0xff]  }
  0x7a   :  { %946 = vmatpush1.bf16.msra.mxu0 %v1869_v7  ;;  %1052 = vmatpush1.bf16.msra.mxu1 %v1872_v8  ;;  %v1955_v7 = vld [vmem:[#allocation5 + $0x3c4] ss:$16 sps:$4 sm:$0xff]   ;;  %v1958_v8 = vld [vmem:[#allocation5 + $0x3cc] ss:$16 sps:$4 sm:$0xff]  }
  0x7b   :  { %947 = vmatprep.subr.bf16.mxu0 %v1877_v10  ;;  %1053 = vmatprep.subr.bf16.mxu1 %v1880_v11  ;;  %v1956_v10 = vld [vmem:[#allocation5 + $0x3c8] ss:$16 sps:$4 sm:$0xff]   ;;  %v1961_v11 = vld [vmem:[#allocation5 + $0x3e4] ss:$16 sps:$4 sm:$0xff]  }
  0x7c   :  { %934 = vmatprep.mubr.bf16.mxu0 %v99_v30  ;;  %1040 = vmatprep.mubr.bf16.mxu1 %v99_v30  ;;  %v1972_v30 = vld [vmem:[#allocation7 + $0x88] sm:$0xff]  }
  0x7e   :  { %948 = vmatpush1.bf16.msra.mxu0 %v1875_v12  ;;  %1054 = vmatpush1.bf16.msra.mxu1 %v1878_v13  ;;  %v1964_v12 = vld [vmem:[#allocation5 + $0x3ec] ss:$16 sps:$4 sm:$0xff]   ;;  %v1959_v13 = vld [vmem:[#allocation5 + $0x3e0] ss:$16 sps:$4 sm:$0xff]  }
  0x7f   :  { %949 = vmatprep.subr.bf16.mxu0 %v1883_v14  ;;  %1055 = vmatprep.subr.bf16.mxu1 %v1886_v15  ;;  %v1962_v14 = vld [vmem:[#allocation5 + $0x3e8] ss:$16 sps:$4 sm:$0xff]   ;;  %v80_v15 = vld [vmem:[#allocation2 + $0x10] sm:$0xff] }
  0x81   :  { %935 = vmatmul.mubr.bf16.gmra.mrb[4].mxu0 %v98_v35  ;;  %1041 = vmatmul.mubr.bf16.gmra.mrb[4].mxu1 %v98_v35  ;;  %v1976_v35 = vld [vmem:[#allocation7 + $0x90] sm:$0xff]  }
  0x82   :  { %950 = vmatpush1.bf16.msra.mxu0 %v1881_v16  ;;  %1056 = vmatpush1.bf16.msra.mxu1 %v1884_v17  ;;  %v84_v16 = vld [vmem:[#allocation2 + $0x30] sm:$0xff]  ;;  %v89_v17 = vld [vmem:[#allocation2 + $0x58] sm:$0xff] }
  0x83   :  { %951 = vmatprep.subr.bf16.mxu0 %v1889_v18  ;;  %1057 = vmatprep.subr.bf16.mxu1 %v1892_v19  ;;  %v93_v18 = vld [vmem:[#allocation2 + $0x78] sm:$0xff]  ;;  %v1965_v19 = vld [vmem:[#allocation7 + $0x40] sm:$0xff]  }
  0x84   :  { %977 = vmatprep.mubr.bf16.mxu0 %v97_v44  ;;  %1083 = vmatprep.mubr.bf16.mxu1 %v97_v44  ;;  %v1985_v44 = vld [vmem:[#allocation7 + $0x68] sm:$0xff]  }
  0x86   :  { %952 = vmatpush1.bf16.msra.mxu0 %v1887_v20  ;;  %1058 = vmatpush1.bf16.msra.mxu1 %v1890_v21  ;;  %v1966_v20 = vld [vmem:[#allocation7 + $0xc0] sm:$0xff]   ;;  %v96_v21 = vpack.c.bf16 %v84_v16, %v80_v15 }
  0x87   :  { %953 = vmatprep.subr.bf16.mxu0 %v1895_v22  ;;  %1059 = vmatprep.subr.bf16.mxu1 %v1898_v23  ;;  %v101_v22 = vpack.c.bf16 %v93_v18, %v89_v17  ;;  %v1967_v23 = vld [vmem:[#allocation7] sm:$0xff]  }
  0x8a   :  { %954 = vmatpush1.bf16.msra.mxu0 %v1893_v24  ;;  %1060 = vmatpush1.bf16.msra.mxu1 %v1896_v25  ;;  %v1968_v24 = vld [vmem:[#allocation7 + $0x80] sm:$0xff]   ;;  %v1969_v25 = vld [vmem:[#allocation7 + $0x48] sm:$0xff]  }
  0x8b   :  { %955 = vmatprep.subr.bf16.mxu0 %v1901_v26  ;;  %1061 = vmatprep.subr.bf16.mxu1 %v1904_v27  ;;  %v1970_v26 = vld [vmem:[#allocation7 + $0xc8] sm:$0xff]   ;;  %v88_v27 = vld [vmem:[#allocation2 + $0x50] sm:$0xff] }
  0x8e   :  { %956 = vmatpush1.bf16.msra.mxu0 %v1899_v33  ;;  %1062 = vmatpush1.bf16.msra.mxu1 %v1902_v34  ;;  %v100_v33 = vpack.c.bf16 %v92_v28, %v88_v27  ;;  %v1975_v34 = vld [vmem:[#allocation7 + $0x10] sm:$0xff]  }
  0x8f   :  { %957 = vmatprep.subr.bf16.mxu0 %v1907_v36  ;;  %1063 = vmatprep.subr.bf16.mxu1 %v1910_v37  ;;  %v1977_v36 = vld [vmem:[#allocation7 + $0x58] sm:$0xff]  }
  0x90   :  { %v1978_v37 = vld [vmem:[#allocation7 + $0xd8] sm:$0xff]  }
  0x92   :  { %958 = vmatpush1.bf16.msra.mxu0 %v1905_v38  ;;  %1064 = vmatpush1.bf16.msra.mxu1 %v1908_v39  ;;  %v1979_v38 = vld [vmem:[#allocation7 + $0x18] sm:$0xff]  }
  0x93   :  { %959 = vmatprep.subr.bf16.mxu0 %v1913_v42  ;;  %1065 = vmatprep.subr.bf16.mxu1 %v1916_v43  ;;  %v1980_v39 = vld [vmem:[#allocation7 + $0x98] sm:$0xff]   ;;  %v1983_v42 = vld [vmem:[#allocation7 + $0x20] sm:$0xff]  }
  0x94   :  { %v1984_v43 = vld [vmem:[#allocation7 + $0xa0] sm:$0xff]  }
  0x96   :  { %960 = vmatpush1.bf16.msra.mxu0 %v1911_v45  ;;  %1066 = vmatpush1.bf16.msra.mxu1 %v1914_v46  ;;  %v1986_v45 = vld [vmem:[#allocation7 + $0xe8] sm:$0xff]  }
  0x97   :  { %961 = vmatprep.subr.bf16.mxu0 %v1919_v47  ;;  %1067 = vmatprep.subr.bf16.mxu1 %v1922_v48  ;;  %v1987_v46 = vld [vmem:[#allocation7 + $0x28] sm:$0xff]   ;;  %v1989_v48 = vld [vmem:[#allocation7 + $0x70] sm:$0xff]  }
  0x98   :  { %v1988_v47 = vld [vmem:[#allocation7 + $0xa8] sm:$0xff]  }
  0x9a   :  { %962 = vmatpush1.bf16.msra.mxu0 %v1917_v49  ;;  %1068 = vmatpush1.bf16.msra.mxu1 %v1920_v50  ;;  %v1990_v49 = vld [vmem:[#allocation7 + $0xf0] sm:$0xff]  }
  0x9b   :  { %963 = vmatprep.subr.bf16.mxu0 %v1925_v51  ;;  %1069 = vmatprep.subr.bf16.mxu1 %v1928_v52  ;;  %v1991_v50 = vld [vmem:[#allocation7 + $0x30] sm:$0xff]   ;;  %v1993_v52 = vld [vmem:[#allocation7 + $0x78] sm:$0xff]  }
  0x9c   :  { %v1992_v51 = vld [vmem:[#allocation7 + $0xb0] sm:$0xff]  }
  0x9e   :  { %964 = vmatpush1.bf16.msra.mxu0 %v1923_v53  ;;  %1070 = vmatpush1.bf16.msra.mxu1 %v1926_v54  ;;  %v1994_v53 = vld [vmem:[#allocation7 + $0xf8] sm:$0xff]  }
  0x9f   :  { %965 = vmatprep.subr.bf16.mxu0 %v1931_v55  ;;  %1071 = vmatprep.subr.bf16.mxu1 %v1934_v56  ;;  %v1995_v54 = vld [vmem:[#allocation7 + $0x38] sm:$0xff]   ;;  %v232_v56 = vlaneseq }
  0xa0   :  { %v1996_v55 = vld [vmem:[#allocation7 + $0xb8] sm:$0xff]  }
  0xa2   :  { %966 = vmatpush1.bf16.msra.mxu0 %v1929_v57  ;;  %1072 = vmatpush1.bf16.msra.mxu1 %v1932_v58  ;;  %v233_v57 = vshrl.u32 %v232_v56, 7 }
  0xa3   :  { %967 = vmatprep.subr.bf16.mxu0 %v1937_v59  ;;  %1073 = vmatprep.subr.bf16.mxu1 %v1940_v60  ;;  %v230_v60 = vld [vmem:[%s2189_s2] sm:$0xf] }
  0xa4   :  { %v234_v58 = vsub.s32 0, %v233_v57  ;;  %v242_v59 = vsub.s32 2, %v233_v57 }
  0xa6   :  { %968 = vmatpush1.bf16.msra.mxu0 %v1935_v61  ;;  %1074 = vmatpush1.bf16.msra.mxu1 %v1938_v62  ;;  %v238_v61 = vsub.s32 1, %v233_v57  ;;  %v246_v62 = vsub.s32 3, %v233_v57 }
  0xa7   :  { %969 = vmatprep.subr.bf16.mxu0 %v1943_v63  ;;  %1075 = vmatprep.subr.bf16.mxu1 %v1946_v0  ;;  %v235_v63 = vrot.slane %v230_v60, %v234_v58  ;;  %v243_v0 = vrot.slane %v230_v60, %v242_v59 }
  0xaa   :  { %970 = vmatpush1.bf16.msra.mxu0 %v1941_v1  ;;  %1076 = vmatpush1.bf16.msra.mxu1 %v1944_v2  ;;  %v239_v1 = vrot.slane %v230_v60, %v238_v61  ;;  %v247_v2 = vrot.slane %v230_v60, %v246_v62 }
  0xab   :  { %971 = vmatprep.subr.bf16.mxu0 %v1949_v3  ;;  %1077 = vmatprep.subr.bf16.mxu1 %v1952_v4 }
  0xae   :  { %972 = vmatpush1.bf16.msra.mxu0 %v1947_v5  ;;  %1078 = vmatpush1.bf16.msra.mxu1 %v1950_v6 }
  0xaf   :  { %973 = vmatprep.subr.bf16.mxu0 %v1955_v7  ;;  %1079 = vmatprep.subr.bf16.mxu1 %v1958_v8 }
  0xb2   :  { %974 = vmatpush1.bf16.msra.mxu0 %v1953_v9  ;;  %1080 = vmatpush1.bf16.msra.mxu1 %v1956_v10 }
  0xb3   :  { %975 = vmatprep.subr.bf16.mxu0 %v1961_v11  ;;  %1081 = vmatprep.subr.bf16.mxu1 %v1964_v12 }
  0xb6   :  { %976 = vmatpush1.bf16.msra.mxu0 %v1959_v13  ;;  %1082 = vmatpush1.bf16.msra.mxu1 %v1962_v14 }
  0xb7   :  { %1673 = vmatprep.subr.bf16.mxu0 %v1965_v19  ;;  %1701 = vmatprep.subr.bf16.mxu1 %v1966_v20 }
  0xb9   :  { %978 = vmatmul.mubr.bf16.vlgmr.msra.gmra.mrb[0].mxu0 %v96_v21  ;;  %1084 = vmatmul.mubr.bf16.vlgmr.msra.gmra.mrb[0].mxu1 %v96_v21 }
  0xba   :  { %987 = vmatprep.mubr.bf16.mxu0 %v101_v22  ;;  %1093 = vmatprep.mubr.bf16.mxu1 %v101_v22 }
  0xbb   :  { %1674 = vmatpush3.bf16.msra.mxu0 %v1967_v23  ;;  %1702 = vmatpush3.bf16.msra.mxu1 %v1968_v24 }
  0xbc   :  { %1675 = vmatprep.subr.bf16.mxu0 %v1969_v25  ;;  %1703 = vmatprep.subr.bf16.mxu1 %v1970_v26 }
  0xbf   :  { %1676 = vmatpush3.bf16.msra.mxu0 %v1971_v29  ;;  %1704 = vmatpush3.bf16.msra.mxu1 %v1972_v30 }
  0xc0   :  { %1677 = vmatprep.subr.bf16.mxu0 %v1973_v31  ;;  %1705 = vmatprep.subr.bf16.mxu1 %v1974_v32 }
  0xc1   :  { %988 = vmatmul.mubr.bf16.gmra.mrb[4].mxu0 %v100_v33  ;;  %1094 = vmatmul.mubr.bf16.gmra.mrb[4].mxu1 %v100_v33 }
  0xc3   :  { %1678 = vmatpush3.bf16.msra.mxu0 %v1975_v34  ;;  %1706 = vmatpush3.bf16.msra.mxu1 %v1976_v35 }
  0xc4   :  { %1679 = vmatprep.subr.bf16.mxu0 %v1977_v36  ;;  %1707 = vmatprep.subr.bf16.mxu1 %v1978_v37 }
  0xc7   :  { %1680 = vmatpush3.bf16.msra.mxu0 %v1979_v38  ;;  %1708 = vmatpush3.bf16.msra.mxu1 %v1980_v39 }
  0xc8   :  { %1681 = vmatprep.subr.bf16.mxu0 %v1981_v40  ;;  %1709 = vmatprep.subr.bf16.mxu1 %v1982_v41 }
  0xcb   :  { %1682 = vmatpush3.bf16.msra.mxu0 %v1983_v42  ;;  %1710 = vmatpush3.bf16.msra.mxu1 %v1984_v43 }
  0xcc   :  { %1683 = vmatprep.subr.bf16.mxu0 %v1985_v44  ;;  %1711 = vmatprep.subr.bf16.mxu1 %v1986_v45 }
  0xcf   :  { %1684 = vmatpush3.bf16.msra.mxu0 %v1987_v46  ;;  %1712 = vmatpush3.bf16.msra.mxu1 %v1988_v47 }
  0xd0   :  { %1685 = vmatprep.subr.bf16.mxu0 %v1989_v48  ;;  %1713 = vmatprep.subr.bf16.mxu1 %v1990_v49 }
  0xd3   :  { %1686 = vmatpush3.bf16.msra.mxu0 %v1991_v50  ;;  %1714 = vmatpush3.bf16.msra.mxu1 %v1992_v51 }
  0xd4   :  { %1687 = vmatprep.subr.bf16.mxu0 %v1993_v52  ;;  %1715 = vmatprep.subr.bf16.mxu1 %v1994_v53 }
  0xd7   :  { %1688 = vmatpush3.bf16.msra.mxu0 %v1995_v54  ;;  %1716 = vmatpush3.bf16.msra.mxu1 %v1996_v55 }
 0x18c   :  { %v979_v3 = vpop.f32.mrb[0].mxu0  ;;  %v1085_v4 = vpop.f32.mrb[0].mxu1 }
 0x18d   :  { %v1729_v5 = vadd.f32 %v979_v3, %v235_v63  ;;  %v1737_v6 = vadd.f32 %v1085_v4, %v243_v0  ;;  %v981_v7 = vpop.f32.mrb[1].mxu0  ;;  %v1087_v8 = vpop.f32.mrb[1].mxu1  ;;  %v1512_v3 = vld [vmem:[%s2191_s4] ss:$0 sm:$0xff]  ;;  %s2100_s4 = smov [#allocation8]  }
 0x18e   :  { %v1730_v9 = vadd.f32 %v981_v7, %v239_v1  ;;  %v1738_v10 = vadd.f32 %v1087_v8, %v247_v2  ;;  %v983_v11 = vpop.f32.mrb[2].mxu0  ;;  %v1089_v12 = vpop.f32.mrb[2].mxu1  ;;  %s1499_s10 = sshll.u32 %s2100_s4, 4  ;;  %s1500_s10 = int_to_ptr.vmem [resolvable:$true] %s1499_s10 }
 0x18f   :  { %v1731_v13 = vadd.f32 %v983_v11, %v235_v63  ;;  %v1739_v14 = vadd.f32 %v1089_v12, %v243_v0  ;;  %v985_v15 = vpop.f32.mrb[3].mxu0  ;;  %v1091_v16 = vpop.f32.mrb[3].mxu1  ;;  %v1104_v19 = vmax.f32 %v1729_v5, 0.0  ;;  %v1106_v20 = vmax.f32 %v1737_v6, 0.0  ;;  %s2063_s11 = scalar_lea.vmem %s1500_s10, 512  ;;  %p2068_p11 = scmp.lt.s32.totalorder %s1500_s10, %s1500_s10 }
 0x190   :  { %v1732_v17 = vadd.f32 %v985_v15, %v239_v1  ;;  %v1740_v18 = vadd.f32 %v1091_v16, %v247_v2  ;;  %v1105_v23 = vmax.f32 %v1730_v9, 0.0  ;;  %v1107_v24 = vmax.f32 %v1738_v10, 0.0  ;;  %p2064_p10 = scmp.ne.s32.totalorder %s1500_s10, %s2063_s11  ;;  %p2069_p12 = scmp.lt.s32.totalorder %s2063_s11, %s2063_s11 }
 0x191   :  { %v1108_v21 = vmax.f32 %v1731_v13, 0.0  ;;  %v1110_v22 = vmax.f32 %v1739_v14, 0.0 }
 0x192   :  { %v1109_v25 = vmax.f32 %v1732_v17, 0.0  ;;  %v1111_v26 = vmax.f32 %v1740_v18, 0.0  ;;  %p2070_p13 = por %p2069_p12, %p2068_p11 }
 0x193   :  { %v1124_v27 = vpack.c.bf16 %v1108_v21, %v1104_v19  ;;  %v1126_v28 = vpack.c.bf16 %v1110_v22, %v1106_v20 }
 0x194   :  { %v1125_v29 = vpack.c.bf16 %v1109_v25, %v1105_v23  ;;  %v1127_v30 = vpack.c.bf16 %v1111_v26, %v1107_v24  ;;  %v989_v31 = vpop.f32.mrb[4].mxu0  ;;  %v1095_v32 = vpop.f32.mrb[4].mxu1  ;;  %p2071_p0 = pnand %p2070_p13, %p2064_p10 }
 0x195   :  { %v1733_v33 = vadd.f32 %v989_v31, %v235_v63  ;;  %v1741_v34 = vadd.f32 %v1095_v32, %v243_v0  ;;  %v991_v35 = vpop.f32.mrb[5].mxu0  ;;  %v1097_v36 = vpop.f32.mrb[5].mxu1 }
 0x196   :  { %v1734_v37 = vadd.f32 %v991_v35, %v239_v1  ;;  %v1742_v38 = vadd.f32 %v1097_v36, %v247_v2  ;;  %v993_v39 = vpop.f32.mrb[6].mxu0  ;;  %v1099_v40 = vpop.f32.mrb[6].mxu1  ;;  %1420 = vmatprep.mubr.bf16.mxu0 %v1125_v29  ;;  %1469 = vmatprep.mubr.bf16.mxu1 %v1127_v30 }
 0x197   :  { %v1735_v41 = vadd.f32 %v993_v39, %v235_v63  ;;  %v1743_v42 = vadd.f32 %v1099_v40, %v243_v0  ;;  %v995_v43 = vpop.f32.mrb[7].mxu0  ;;  %v1101_v44 = vpop.f32.mrb[7].mxu1  ;;  %1421 = vmatmul.mubr.bf16.vlgmr.msra.gmra.mrb[8].mxu0 %v1124_v27  ;;  %1470 = vmatmul.mubr.bf16.vlgmr.msra.gmra.mrb[8].mxu1 %v1126_v28  ;;  %v1112_v47 = vmax.f32 %v1733_v33, 0.0  ;;  %v1114_v48 = vmax.f32 %v1741_v34, 0.0 }
 0x198   :  { %v1736_v45 = vadd.f32 %v995_v43, %v239_v1  ;;  %v1744_v46 = vadd.f32 %v1101_v44, %v247_v2  ;;  %v1113_v51 = vmax.f32 %v1734_v37, 0.0  ;;  %v1115_v52 = vmax.f32 %v1742_v38, 0.0 }
 0x199   :  { %v1116_v49 = vmax.f32 %v1735_v41, 0.0  ;;  %v1118_v50 = vmax.f32 %v1743_v42, 0.0 }
 0x19a   :  { %v1117_v53 = vmax.f32 %v1736_v45, 0.0  ;;  %v1119_v54 = vmax.f32 %v1744_v46, 0.0 }
 0x19b   :  { %v1128_v55 = vpack.c.bf16 %v1116_v49, %v1112_v47  ;;  %v1130_v56 = vpack.c.bf16 %v1118_v50, %v1114_v48 }
 0x19c   :  { %v1129_v57 = vpack.c.bf16 %v1117_v53, %v1113_v51  ;;  %v1131_v58 = vpack.c.bf16 %v1119_v54, %v1115_v52 }
 0x19e   :  { %1428 = vmatprep.mubr.bf16.mxu0 %v1129_v57  ;;  %1477 = vmatprep.mubr.bf16.mxu1 %v1131_v58 }
 0x19f   :  { %1429 = vmatmul.mubr.bf16.gmra.mrb[12].mxu0 %v1128_v55  ;;  %1478 = vmatmul.mubr.bf16.gmra.mrb[12].mxu1 %v1130_v56 }
 0x26a   :  { %v1689_v59 = vpop.f32.mrb[8].mxu0  ;;  %v1717_v60 = vpop.f32.mrb[8].mxu1 }
 0x26b   :  { %v1690_v61 = vpop.f32.mrb[9].mxu0  ;;  %v1718_v62 = vpop.f32.mrb[9].mxu1 }
 0x26c   :  { %v1691_v63 = vadd.f32 %v1690_v61, %v1689_v59  ;;  %v1719_v0 = vadd.f32 %v1718_v62, %v1717_v60  ;;  %v1692_v1 = vpop.f32.mrb[10].mxu0  ;;  %v1720_v2 = vpop.f32.mrb[10].mxu1 }
 0x26d   :  { %v1693_v4 = vpop.f32.mrb[11].mxu0  ;;  %v1721_v5 = vpop.f32.mrb[11].mxu1 }
 0x26e   :  { %v1472_v6 = vadd.f32 %v1719_v0, %v1691_v63  ;;  %v1694_v7 = vadd.f32 %v1693_v4, %v1692_v1  ;;  %v1722_v8 = vadd.f32 %v1721_v5, %v1720_v2 }
 0x270   :  { %v1486_v9 = vadd.f32 %v1512_v3, %v1472_v6  ;;  %v1475_v10 = vadd.f32 %v1722_v8, %v1694_v7 }
 0x272   :  { %1490 = vst [vmem:[#allocation8] sm:$0xff] %v1486_v9  ;;  %v1487_v11 = vadd.f32 %v1512_v3, %v1475_v10  ;;  %v1695_v12 = vpop.f32.mrb[12].mxu0  ;;  %v1723_v13 = vpop.f32.mrb[12].mxu1 }
 0x273   :  { %v1696_v14 = vpop.f32.mrb[13].mxu0  ;;  %v1724_v15 = vpop.f32.mrb[13].mxu1 }
 0x274   :  { %1491 = vst [vmem:[#allocation8 + $0x8] sm:$0xff] %v1487_v11  ;;  %v1697_v16 = vadd.f32 %v1696_v14, %v1695_v12  ;;  %v1725_v17 = vadd.f32 %v1724_v15, %v1723_v13  ;;  %v1698_v18 = vpop.f32.mrb[14].mxu0  ;;  %v1726_v19 = vpop.f32.mrb[14].mxu1 }
 0x275   :  { %v1699_v20 = vpop.f32.mrb[15].mxu0  ;;  %v1727_v21 = vpop.f32.mrb[15].mxu1 }
 0x276   :  { %v1480_v22 = vadd.f32 %v1725_v17, %v1697_v16  ;;  %v1700_v23 = vadd.f32 %v1699_v20, %v1698_v18  ;;  %v1728_v24 = vadd.f32 %v1727_v21, %v1726_v19 }
 0x278   :  { %v1488_v25 = vadd.f32 %v1512_v3, %v1480_v22  ;;  %v1483_v26 = vadd.f32 %v1728_v24, %v1700_v23 }
 0x27a   :  { %1492 = vst [vmem:[#allocation8 + $0x10] sm:$0xff] %v1488_v25  ;;  %v1489_v27 = vadd.f32 %v1512_v3, %v1483_v26 }
 0x27c   :  { %1493 = vst [vmem:[#allocation8 + $0x18] sm:$0xff] %v1489_v27 }
 0x27d   :  { %2074 = shalt.err (!%p2071_p0)
}
 0x27e   :  { %s2075_s14 = scalar_lea.hbm %s2192_s5, 512 }
 0x27f   :  { %p2076_p1 = scmp.ne.s32.totalorder %s2192_s5, %s2075_s14  ;;  %p2079_p2 = scmp.lt.u32.totalorder %s2075_s14, %s2192_s5 }
 0x281   :  { %p2081_p3 = pnand %p2079_p2, %p2076_p1 }
 0x283   :  { %2084 = shalt.err (!%p2081_p3)
}
 0x284   :  { %s2101_s18 = smov 128   ;;  %s2102_s19 = smov 8  }
 0x285   :  { %1505 = dma.vmem_to_hbm [thread:$0]  %s1500_s10, 512, %s2192_s5, [#allocation4], %s2101_s18, %s2101_s18, %s2102_s19  }
 0x286   :  { %2089 = dma.done.wait [#allocation4], 512  }
 0x287   :  { %2090 = vsyncadd [#allocation4], 4294966784 }
 0x288   :  { %1509 = vsyncpa [#allocation3], 1 }
 0x289   :  { %1510 = vsyncpa [#allocation6], 1 }
 0x28a   :  { %1511 = vsyncpa [#allocation4], 1 }

// kernel: tpu_custom_call.1
= control target key start
LH: loop header
LB: loop body
LE: loop exit
PB: predicated region body
PF: predicated region fallthrough
CT: control target
= control target key end

     0   :  { %10 = vsyncpa [#allocation3], 0  ;;  %s2187_s0 = inlined_call_operand.hbm [shape: f32[32,512], index: 0, kind: input, shape index: {}]   ;;  %s2188_s1 = inlined_call_operand.hbm [shape: bf16[512,512], index: 1, kind: input, shape index: {}]   ;;  %s2189_s2 = inlined_call_operand.vmem [shape: f32[1,512], index: 2, kind: input, shape index: {}]   ;;  %s2190_s3 = inlined_call_operand.hbm [shape: bf16[512,128], index: 3, kind: input, shape index: {}]   ;;  %s2191_s4 = inlined_call_operand.vmem [shape: f32[1,128], index: 4, kind: input, shape index: {}]   ;;  %s2192_s5 = inlined_call_operand.hbm [shape: f32[32,128], index: 5, kind: output, shape index: {}]  }
   0x1   :  { %11 = vsyncpa [#allocation6], 0 }
   0x2   :  { %12 = vsyncpa [#allocation4], 0  ;;  %s2091_s18 = smov [#allocation5]   ;;  %s1997_s22 = scalar_lea.hbm %s2188_s1, 16384 }
   0x3   :  { %s30_s19 = sshll.u32 %s2091_s18, 4  ;;  %p1998_p0 = scmp.ne.s32.totalorder %s2188_s1, %s1997_s22  ;;  %s31_s19 = int_to_ptr.vmem [resolvable:$true] %s30_s19 }
   0x4   :  { %p2001_p1 = scmp.lt.u32.totalorder %s1997_s22, %s2188_s1 }
   0x6   :  { %p2003_p2 = pnand %p2001_p1, %p1998_p0 }
   0x8   :  { %2006 = shalt.err (!%p2003_p2)
}
   0x9   :  { %s2007_s27 = scalar_lea.vmem %s31_s19, 16384  ;;  %p2012_p4 = scmp.lt.s32.totalorder %s31_s19, %s31_s19 }
   0xa   :  { %p2008_p3 = scmp.ne.s32.totalorder %s31_s19, %s2007_s27  ;;  %p2013_p5 = scmp.lt.s32.totalorder %s2007_s27, %s2007_s27 }
   0xc   :  { %p2014_p6 = por %p2013_p5, %p2012_p4 }
   0xe   :  { %p2015_p7 = pnand %p2014_p6, %p2008_p3 }
  0x10   :  { %2018 = shalt.err (!%p2015_p7)
}
  0x11   :  { %s2092_s28 = smov 256   ;;  %s2093_s29 = smov 16  }
  0x12   :  { %36 = dma.hbm_to_vmem [thread:$0]  %s2188_s1, 16384, %s31_s19, [#allocation6], %s2092_s28, %s2092_s28, %s2093_s29  }
  0x13   :  { %s2094_s7 = smov [#allocation2]   ;;  %s2019_s11 = scalar_lea.hbm %s2187_s0, 2048 }
  0x14   :  { %s18_s8 = sshll.u32 %s2094_s7, 4  ;;  %p2020_p8 = scmp.ne.s32.totalorder %s2187_s0, %s2019_s11  ;;  %s19_s8 = int_to_ptr.vmem [resolvable:$true] %s18_s8 }
  0x15   :  { %p2023_p9 = scmp.lt.u32.totalorder %s2019_s11, %s2187_s0 }
  0x17   :  { %p2025_p10 = pnand %p2023_p9, %p2020_p8 }
  0x19   :  { %2028 = shalt.err (!%p2025_p10)
}
  0x1a   :  { %s2029_s16 = scalar_lea.vmem %s19_s8, 2048  ;;  %p2034_p12 = scmp.lt.s32.totalorder %s19_s8, %s19_s8 }
  0x1b   :  { %p2030_p11 = scmp.ne.s32.totalorder %s19_s8, %s2029_s16  ;;  %p2035_p13 = scmp.lt.s32.totalorder %s2029_s16, %s2029_s16 }
  0x1d   :  { %p2036_p0 = por %p2035_p13, %p2034_p12 }
  0x1f   :  { %p2037_p1 = pnand %p2036_p0, %p2030_p11 }
  0x21   :  { %2040 = shalt.err (!%p2037_p1)
}
  0x22   :  { %s2095_s1 = smov 512   ;;  %s2096_s17 = smov 32  }
  0x23   :  { %24 = dma.hbm_to_vmem [thread:$0]  %s2187_s0, 2048, %s19_s8, [#allocation3], %s2095_s1, %s2095_s1, %s2096_s17  }
  0x24   :  { %s2097_s20 = smov [#allocation7]   ;;  %s2041_s24 = scalar_lea.hbm %s2190_s3, 4096 }
  0x25   :  { %s44_s21 = sshll.u32 %s2097_s20, 4  ;;  %p2042_p2 = scmp.ne.s32.totalorder %s2190_s3, %s2041_s24  ;;  %s45_s21 = int_to_ptr.vmem [resolvable:$true] %s44_s21 }
  0x26   :  { %p2045_p3 = scmp.lt.u32.totalorder %s2041_s24, %s2190_s3 }
  0x28   :  { %p2047_p4 = pnand %p2045_p3, %p2042_p2 }
  0x2a   :  { %2050 = shalt.err (!%p2047_p4)
}
  0x2b   :  { %s2051_s29 = scalar_lea.vmem %s45_s21, 4096  ;;  %p2056_p6 = scmp.lt.s32.totalorder %s45_s21, %s45_s21 }
  0x2c   :  { %p2052_p5 = scmp.ne.s32.totalorder %s45_s21, %s2051_s29  ;;  %p2057_p7 = scmp.lt.s32.totalorder %s2051_s29, %s2051_s29 }
  0x2e   :  { %p2058_p8 = por %p2057_p7, %p2056_p6 }
  0x30   :  { %p2059_p9 = pnand %p2058_p8, %p2052_p5 }
  0x32   :  { %2062 = shalt.err (!%p2059_p9)
}
  0x33   :  { %s2098_s0 = smov 64   ;;  %s2099_s30 = smov 4  }
  0x34   :  { %50 = dma.hbm_to_vmem [thread:$0]  %s2190_s3, 4096, %s45_s21, [#allocation6], %s2098_s0, %s2098_s0, %s2099_s30  }
  0x35   :  { %2085 = dma.done.wait [#allocation3], 2048  }
  0x36   :  { %2086 = vsyncadd [#allocation3], 4294965248 }
  0x37   :  { %2087 = dma.done.wait [#allocation6], 20480  }
  0x38   :  { %2088 = vsyncadd [#allocation6], 4294946816  ;;  %v1773_v0 = vld [vmem:[#allocation5 + $0x4] ss:$16 sps:$4 sm:$0xff]   ;;  %v1775_v1 = vld [vmem:[#allocation5 + $0xc] ss:$16 sps:$4 sm:$0xff]  }
  0x39   :  { %892 = vmatprep.subr.bf16.mxu0 %v1773_v0  ;;  %v1777_v2 = vld [vmem:[#allocation5] ss:$16 sps:$4 sm:$0xff]   ;;  %v1778_v3 = vld [vmem:[#allocation5 + $0x8] ss:$16 sps:$4 sm:$0xff]   ;;  %998 = vmatprep.subr.bf16.mxu1 %v1775_v1  ;;  %v1779_v4 = vld [vmem:[#allocation5 + $0x24] ss:$16 sps:$4 sm:$0xff]  }
  0x3a   :  { %893 = vmatpush1.bf16.msra.mxu0 %v1777_v2  ;;  %999 = vmatpush1.bf16.msra.mxu1 %v1778_v3  ;;  %v1781_v5 = vld [vmem:[#allocation5 + $0x2c] ss:$16 sps:$4 sm:$0xff]   ;;  %v1783_v6 = vld [vmem:[#allocation5 + $0x20] ss:$16 sps:$4 sm:$0xff]   ;;  %v1784_v7 = vld [vmem:[#allocation5 + $0x28] ss:$16 sps:$4 sm:$0xff]  }
  0x3b   :  { %894 = vmatprep.subr.bf16.mxu0 %v1779_v4  ;;  %1000 = vmatprep.subr.bf16.mxu1 %v1781_v5  ;;  %v1785_v8 = vld [vmem:[#allocation5 + $0x44] ss:$16 sps:$4 sm:$0xff]   ;;  %v1787_v9 = vld [vmem:[#allocation5 + $0x4c] ss:$16 sps:$4 sm:$0xff]   ;;  %v1789_v10 = vld [vmem:[#allocation5 + $0x40] ss:$16 sps:$4 sm:$0xff]  }
  0x3c   :  { %v1790_v11 = vld [vmem:[#allocation5 + $0x48] ss:$16 sps:$4 sm:$0xff]   ;;  %v1791_v12 = vld [vmem:[#allocation5 + $0x64] ss:$16 sps:$4 sm:$0xff]   ;;  %v1793_v13 = vld [vmem:[#allocation5 + $0x6c] ss:$16 sps:$4 sm:$0xff]  }
  0x3d   :  { %v1795_v14 = vld [vmem:[#allocation5 + $0x60] ss:$16 sps:$4 sm:$0xff]   ;;  %v1796_v15 = vld [vmem:[#allocation5 + $0x68] ss:$16 sps:$4 sm:$0xff]   ;;  %v1797_v16 = vld [vmem:[#allocation5 + $0x84] ss:$16 sps:$4 sm:$0xff]  }
  0x3e   :  { %895 = vmatpush1.bf16.msra.mxu0 %v1783_v6  ;;  %1001 = vmatpush1.bf16.msra.mxu1 %v1784_v7  ;;  %v1799_v17 = vld [vmem:[#allocation5 + $0x8c] ss:$16 sps:$4 sm:$0xff]   ;;  %v1801_v18 = vld [vmem:[#allocation5 + $0x80] ss:$16 sps:$4 sm:$0xff]   ;;  %v1802_v19 = vld [vmem:[#allocation5 + $0x88] ss:$16 sps:$4 sm:$0xff]  }
  0x3f   :  { %896 = vmatprep.subr.bf16.mxu0 %v1785_v8  ;;  %1002 = vmatprep.subr.bf16.mxu1 %v1787_v9  ;;  %v1803_v20 = vld [vmem:[#allocation5 + $0xa4] ss:$16 sps:$4 sm:$0xff]   ;;  %v1805_v21 = vld [vmem:[#allocation5 + $0xac] ss:$16 sps:$4 sm:$0xff]   ;;  %v1807_v22 = vld [vmem:[#allocation5 + $0xa0] ss:$16 sps:$4 sm:$0xff]  }
  0x40   :  { %v1808_v23 = vld [vmem:[#allocation5 + $0xa8] ss:$16 sps:$4 sm:$0xff]   ;;  %v1809_v24 = vld [vmem:[#allocation5 + $0xc4] ss:$16 sps:$4 sm:$0xff]   ;;  %v1811_v25 = vld [vmem:[#allocation5 + $0xcc] ss:$16 sps:$4 sm:$0xff]  }
  0x41   :  { %v1813_v26 = vld [vmem:[#allocation5 + $0xc0] ss:$16 sps:$4 sm:$0xff]   ;;  %v1814_v27 = vld [vmem:[#allocation5 + $0xc8] ss:$16 sps:$4 sm:$0xff]   ;;  %v1815_v28 = vld [vmem:[#allocation5 + $0xe4] ss:$16 sps:$4 sm:$0xff]  }
  0x42   :  { %897 = vmatpush1.bf16.msra.mxu0 %v1789_v10  ;;  %1003 = vmatpush1.bf16.msra.mxu1 %v1790_v11  ;;  %v1817_v29 = vld [vmem:[#allocation5 + $0xec] ss:$16 sps:$4 sm:$0xff]   ;;  %v1819_v30 = vld [vmem:[#allocation5 + $0xe0] ss:$16 sps:$4 sm:$0xff]   ;;  %v1820_v31 = vld [vmem:[#allocation5 + $0xe8] ss:$16 sps:$4 sm:$0xff]  }
  0x43   :  { %898 = vmatprep.subr.bf16.mxu0 %v1791_v12  ;;  %1004 = vmatprep.subr.bf16.mxu1 %v1793_v13  ;;  %v1821_v32 = vld [vmem:[#allocation5 + $0x104] ss:$16 sps:$4 sm:$0xff]   ;;  %v1823_v33 = vld [vmem:[#allocation5 + $0x10c] ss:$16 sps:$4 sm:$0xff]   ;;  %v1825_v34 = vld [vmem:[#allocation5 + $0x100] ss:$16 sps:$4 sm:$0xff]  }
  0x44   :  { %v1826_v35 = vld [vmem:[#allocation5 + $0x108] ss:$16 sps:$4 sm:$0xff]   ;;  %v1827_v36 = vld [vmem:[#allocation5 + $0x124] ss:$16 sps:$4 sm:$0xff]   ;;  %v1829_v37 = vld [vmem:[#allocation5 + $0x12c] ss:$16 sps:$4 sm:$0xff]  }
  0x45   :  { %v1831_v38 = vld [vmem:[#allocation5 + $0x120] ss:$16 sps:$4 sm:$0xff]   ;;  %v1832_v39 = vld [vmem:[#allocation5 + $0x128] ss:$16 sps:$4 sm:$0xff]   ;;  %v1833_v40 = vld [vmem:[#allocation5 + $0x144] ss:$16 sps:$4 sm:$0xff]  }
  0x46   :  { %899 = vmatpush1.bf16.msra.mxu0 %v1795_v14  ;;  %1005 = vmatpush1.bf16.msra.mxu1 %v1796_v15  ;;  %v1835_v41 = vld [vmem:[#allocation5 + $0x14c] ss:$16 sps:$4 sm:$0xff]   ;;  %v1837_v42 = vld [vmem:[#allocation5 + $0x140] ss:$16 sps:$4 sm:$0xff]   ;;  %v1838_v43 = vld [vmem:[#allocation5 + $0x148] ss:$16 sps:$4 sm:$0xff]  }
  0x47   :  { %900 = vmatprep.subr.bf16.mxu0 %v1797_v16  ;;  %1006 = vmatprep.subr.bf16.mxu1 %v1799_v17  ;;  %v1839_v44 = vld [vmem:[#allocation5 + $0x164] ss:$16 sps:$4 sm:$0xff]   ;;  %v1841_v45 = vld [vmem:[#allocation5 + $0x16c] ss:$16 sps:$4 sm:$0xff]   ;;  %v1843_v48 = vld [vmem:[#allocation5 + $0x160] ss:$16 sps:$4 sm:$0xff]  }
  0x48   :  { %v79_v46 = vld [vmem:[#allocation2 + $0x8] sm:$0xff]  ;;  %v1845_v51 = vld [vmem:[#allocation5 + $0x184] ss:$16 sps:$4 sm:$0xff]   ;;  %v1849_v53 = vld [vmem:[#allocation5 + $0x180] ss:$16 sps:$4 sm:$0xff]  }
  0x49   :  { %v83_v47 = vld [vmem:[#allocation2 + $0x28] sm:$0xff]  ;;  %v1851_v55 = vld [vmem:[#allocation5 + $0x1a4] ss:$16 sps:$4 sm:$0xff]   ;;  %v1855_v57 = vld [vmem:[#allocation5 + $0x1a0] ss:$16 sps:$4 sm:$0xff]  }
  0x4a   :  { %901 = vmatpush1.bf16.msra.mxu0 %v1801_v18  ;;  %1007 = vmatpush1.bf16.msra.mxu1 %v1802_v19  ;;  %v1844_v49 = vld [vmem:[#allocation5 + $0x168] ss:$16 sps:$4 sm:$0xff]   ;;  %v95_v50 = vpack.c.bf16 %v83_v47, %v79_v46  ;;  %v1847_v52 = vld [vmem:[#allocation5 + $0x18c] ss:$16 sps:$4 sm:$0xff]   ;;  %v1857_v59 = vld [vmem:[#allocation5 + $0x1c4] ss:$16 sps:$4 sm:$0xff]  }
  0x4b   :  { %902 = vmatprep.subr.bf16.mxu0 %v1803_v20  ;;  %1008 = vmatprep.subr.bf16.mxu1 %v1805_v21  ;;  %v1850_v54 = vld [vmem:[#allocation5 + $0x188] ss:$16 sps:$4 sm:$0xff]   ;;  %v1853_v56 = vld [vmem:[#allocation5 + $0x1ac] ss:$16 sps:$4 sm:$0xff]   ;;  %v1861_v61 = vld [vmem:[#allocation5 + $0x1c0] ss:$16 sps:$4 sm:$0xff]  }
  0x4c   :  { %924 = vmatprep.mubr.bf16.mxu0 %v95_v50  ;;  %1030 = vmatprep.mubr.bf16.mxu1 %v95_v50  ;;  %v1856_v58 = vld [vmem:[#allocation5 + $0x1a8] ss:$16 sps:$4 sm:$0xff]   ;;  %v1859_v60 = vld [vmem:[#allocation5 + $0x1cc] ss:$16 sps:$4 sm:$0xff]   ;;  %v1863_v63 = vld [vmem:[#allocation5 + $0x1e4] ss:$16 sps:$4 sm:$0xff]  }
  0x4d   :  { %v1862_v62 = vld [vmem:[#allocation5 + $0x1c8] ss:$16 sps:$4 sm:$0xff]   ;;  %v1865_v0 = vld [vmem:[#allocation5 + $0x1ec] ss:$16 sps:$4 sm:$0xff]   ;;  %v1867_v1 = vld [vmem:[#allocation5 + $0x1e0] ss:$16 sps:$4 sm:$0xff]  }
  0x4e   :  { %903 = vmatpush1.bf16.msra.mxu0 %v1807_v22  ;;  %1009 = vmatpush1.bf16.msra.mxu1 %v1808_v23  ;;  %v1868_v2 = vld [vmem:[#allocation5 + $0x1e8] ss:$16 sps:$4 sm:$0xff]   ;;  %v1871_v3 = vld [vmem:[#allocation5 + $0x204] ss:$16 sps:$4 sm:$0xff]   ;;  %v1874_v6 = vld [vmem:[#allocation5 + $0x20c] ss:$16 sps:$4 sm:$0xff]  }
  0x4f   :  { %904 = vmatprep.subr.bf16.mxu0 %v1809_v24  ;;  %1010 = vmatprep.subr.bf16.mxu1 %v1811_v25  ;;  %v78_v4 = vld [vmem:[#allocation2] sm:$0xff]  ;;  %v1872_v8 = vld [vmem:[#allocation5 + $0x208] ss:$16 sps:$4 sm:$0xff]   ;;  %v1880_v11 = vld [vmem:[#allocation5 + $0x22c] ss:$16 sps:$4 sm:$0xff]  }
  0x50   :  { %v82_v5 = vld [vmem:[#allocation2 + $0x20] sm:$0xff]  ;;  %v1878_v13 = vld [vmem:[#allocation5 + $0x228] ss:$16 sps:$4 sm:$0xff]   ;;  %v1886_v15 = vld [vmem:[#allocation5 + $0x24c] ss:$16 sps:$4 sm:$0xff]  }
  0x51   :  { %v1869_v7 = vld [vmem:[#allocation5 + $0x200] ss:$16 sps:$4 sm:$0xff]   ;;  %v94_v9 = vpack.c.bf16 %v82_v5, %v78_v4  ;;  %v1877_v10 = vld [vmem:[#allocation5 + $0x224] ss:$16 sps:$4 sm:$0xff]   ;;  %v1884_v17 = vld [vmem:[#allocation5 + $0x248] ss:$16 sps:$4 sm:$0xff]  }
  0x52   :  { %905 = vmatpush1.bf16.msra.mxu0 %v1813_v26  ;;  %1011 = vmatpush1.bf16.msra.mxu1 %v1814_v27  ;;  %v1875_v12 = vld [vmem:[#allocation5 + $0x220] ss:$16 sps:$4 sm:$0xff]   ;;  %v1883_v14 = vld [vmem:[#allocation5 + $0x244] ss:$16 sps:$4 sm:$0xff]   ;;  %v1892_v19 = vld [vmem:[#allocation5 + $0x26c] ss:$16 sps:$4 sm:$0xff]  }
  0x53   :  { %906 = vmatprep.subr.bf16.mxu0 %v1815_v28  ;;  %1012 = vmatprep.subr.bf16.mxu1 %v1817_v29  ;;  %v1881_v16 = vld [vmem:[#allocation5 + $0x240] ss:$16 sps:$4 sm:$0xff]   ;;  %v1889_v18 = vld [vmem:[#allocation5 + $0x264] ss:$16 sps:$4 sm:$0xff]   ;;  %v1890_v21 = vld [vmem:[#allocation5 + $0x268] ss:$16 sps:$4 sm:$0xff]  }
  0x54   :  { %v1887_v20 = vld [vmem:[#allocation5 + $0x260] ss:$16 sps:$4 sm:$0xff]   ;;  %v1895_v22 = vld [vmem:[#allocation5 + $0x284] ss:$16 sps:$4 sm:$0xff]   ;;  %v1898_v23 = vld [vmem:[#allocation5 + $0x28c] ss:$16 sps:$4 sm:$0xff]  }
  0x55   :  { %v1893_v24 = vld [vmem:[#allocation5 + $0x280] ss:$16 sps:$4 sm:$0xff]   ;;  %v1896_v25 = vld [vmem:[#allocation5 + $0x288] ss:$16 sps:$4 sm:$0xff]   ;;  %v1901_v26 = vld [vmem:[#allocation5 + $0x2a4] ss:$16 sps:$4 sm:$0xff]  }
  0x56   :  { %907 = vmatpush1.bf16.msra.mxu0 %v1819_v30  ;;  %1013 = vmatpush1.bf16.msra.mxu1 %v1820_v31  ;;  %v1904_v27 = vld [vmem:[#allocation5 + $0x2ac] ss:$16 sps:$4 sm:$0xff]   ;;  %v86_v31 = vld [vmem:[#allocation2 + $0x40] sm:$0xff]  ;;  %v1914_v46 = vld [vmem:[#allocation5 + $0x2e8] ss:$16 sps:$4 sm:$0xff]  }
  0x57   :  { %908 = vmatprep.subr.bf16.mxu0 %v1821_v32  ;;  %1014 = vmatprep.subr.bf16.mxu1 %v1823_v33  ;;  %v87_v28 = vld [vmem:[#allocation2 + $0x48] sm:$0xff]  ;;  %v90_v32 = vld [vmem:[#allocation2 + $0x60] sm:$0xff] }
  0x58   :  { %v91_v29 = vld [vmem:[#allocation2 + $0x68] sm:$0xff]  ;;  %v1899_v33 = vld [vmem:[#allocation5 + $0x2a0] ss:$16 sps:$4 sm:$0xff]   ;;  %v1919_v47 = vld [vmem:[#allocation5 + $0x304] ss:$16 sps:$4 sm:$0xff]  }
  0x59   :  { %v99_v30 = vpack.c.bf16 %v91_v29, %v87_v28  ;;  %v1920_v50 = vld [vmem:[#allocation5 + $0x308] ss:$16 sps:$4 sm:$0xff]   ;;  %v1952_v4 = vld [vmem:[#allocation5 + $0x3ac] ss:$16 sps:$4 sm:$0xff]   ;;  %v1947_v5 = vld [vmem:[#allocation5 + $0x3a0] ss:$16 sps:$4 sm:$0xff]  }
  0x5a   :  { %909 = vmatpush1.bf16.msra.mxu0 %v1825_v34  ;;  %1015 = vmatpush1.bf16.msra.mxu1 %v1826_v35  ;;  %v1902_v34 = vld [vmem:[#allocation5 + $0x2a8] ss:$16 sps:$4 sm:$0xff]   ;;  %v98_v35 = vpack.c.bf16 %v90_v32, %v86_v31  ;;  %v92_v28 = vld [vmem:[#allocation2 + $0x70] sm:$0xff] }
  0x5b   :  { %910 = vmatprep.subr.bf16.mxu0 %v1827_v36  ;;  %1016 = vmatprep.subr.bf16.mxu1 %v1829_v37  ;;  %v1907_v36 = vld [vmem:[#allocation5 + $0x2c4] ss:$16 sps:$4 sm:$0xff]   ;;  %v1910_v37 = vld [vmem:[#allocation5 + $0x2cc] ss:$16 sps:$4 sm:$0xff]  }
  0x5c   :  { %v1971_v29 = vld [vmem:[#allocation7 + $0x8] sm:$0xff]   ;;  %v1973_v31 = vld [vmem:[#allocation7 + $0x50] sm:$0xff]  }
  0x5d   :  { %v1974_v32 = vld [vmem:[#allocation7 + $0xd0] sm:$0xff]  }
  0x5e   :  { %911 = vmatpush1.bf16.msra.mxu0 %v1831_v38  ;;  %1017 = vmatpush1.bf16.msra.mxu1 %v1832_v39  ;;  %v1905_v38 = vld [vmem:[#allocation5 + $0x2c0] ss:$16 sps:$4 sm:$0xff]   ;;  %v1908_v39 = vld [vmem:[#allocation5 + $0x2c8] ss:$16 sps:$4 sm:$0xff]  }
  0x5f   :  { %912 = vmatprep.subr.bf16.mxu0 %v1833_v40  ;;  %1018 = vmatprep.subr.bf16.mxu1 %v1835_v41  ;;  %v81_v40 = vld [vmem:[#allocation2 + $0x18] sm:$0xff] }
  0x60   :  { %v85_v41 = vld [vmem:[#allocation2 + $0x38] sm:$0xff] }
  0x62   :  { %913 = vmatpush1.bf16.msra.mxu0 %v1837_v42  ;;  %1019 = vmatpush1.bf16.msra.mxu1 %v1838_v43  ;;  %v1913_v42 = vld [vmem:[#allocation5 + $0x2e4] ss:$16 sps:$4 sm:$0xff]   ;;  %v1916_v43 = vld [vmem:[#allocation5 + $0x2ec] ss:$16 sps:$4 sm:$0xff]  }
  0x63   :  { %914 = vmatprep.subr.bf16.mxu0 %v1839_v44  ;;  %1020 = vmatprep.subr.bf16.mxu1 %v1841_v45  ;;  %v97_v44 = vpack.c.bf16 %v85_v41, %v81_v40  ;;  %v1911_v45 = vld [vmem:[#allocation5 + $0x2e0] ss:$16 sps:$4 sm:$0xff]  }
  0x64   :  { %v1981_v40 = vld [vmem:[#allocation7 + $0x60] sm:$0xff]  }
  0x65   :  { %v1982_v41 = vld [vmem:[#allocation7 + $0xe0] sm:$0xff]  }
  0x66   :  { %915 = vmatpush1.bf16.msra.mxu0 %v1843_v48  ;;  %1021 = vmatpush1.bf16.msra.mxu1 %v1844_v49  ;;  %v1922_v48 = vld [vmem:[#allocation5 + $0x30c] ss:$16 sps:$4 sm:$0xff]   ;;  %v1917_v49 = vld [vmem:[#allocation5 + $0x300] ss:$16 sps:$4 sm:$0xff]  }
  0x67   :  { %916 = vmatprep.subr.bf16.mxu0 %v1845_v51  ;;  %1022 = vmatprep.subr.bf16.mxu1 %v1847_v52  ;;  %v1925_v51 = vld [vmem:[#allocation5 + $0x324] ss:$16 sps:$4 sm:$0xff]   ;;  %v1928_v52 = vld [vmem:[#allocation5 + $0x32c] ss:$16 sps:$4 sm:$0xff]  }
  0x6a   :  { %917 = vmatpush1.bf16.msra.mxu0 %v1849_v53  ;;  %1023 = vmatpush1.bf16.msra.mxu1 %v1850_v54  ;;  %v1923_v53 = vld [vmem:[#allocation5 + $0x320] ss:$16 sps:$4 sm:$0xff]   ;;  %v1926_v54 = vld [vmem:[#allocation5 + $0x328] ss:$16 sps:$4 sm:$0xff]  }
  0x6b   :  { %918 = vmatprep.subr.bf16.mxu0 %v1851_v55  ;;  %1024 = vmatprep.subr.bf16.mxu1 %v1853_v56  ;;  %v1931_v55 = vld [vmem:[#allocation5 + $0x344] ss:$16 sps:$4 sm:$0xff]   ;;  %v1934_v56 = vld [vmem:[#allocation5 + $0x34c] ss:$16 sps:$4 sm:$0xff]  }
  0x6e   :  { %919 = vmatpush1.bf16.msra.mxu0 %v1855_v57  ;;  %1025 = vmatpush1.bf16.msra.mxu1 %v1856_v58  ;;  %v1929_v57 = vld [vmem:[#allocation5 + $0x340] ss:$16 sps:$4 sm:$0xff]   ;;  %v1932_v58 = vld [vmem:[#allocation5 + $0x348] ss:$16 sps:$4 sm:$0xff]  }
  0x6f   :  { %920 = vmatprep.subr.bf16.mxu0 %v1857_v59  ;;  %1026 = vmatprep.subr.bf16.mxu1 %v1859_v60  ;;  %v1937_v59 = vld [vmem:[#allocation5 + $0x364] ss:$16 sps:$4 sm:$0xff]   ;;  %v1940_v60 = vld [vmem:[#allocation5 + $0x36c] ss:$16 sps:$4 sm:$0xff]  }
  0x72   :  { %921 = vmatpush1.bf16.msra.mxu0 %v1861_v61  ;;  %1027 = vmatpush1.bf16.msra.mxu1 %v1862_v62  ;;  %v1935_v61 = vld [vmem:[#allocation5 + $0x360] ss:$16 sps:$4 sm:$0xff]   ;;  %v1938_v62 = vld [vmem:[#allocation5 + $0x368] ss:$16 sps:$4 sm:$0xff]  }
  0x73   :  { %922 = vmatprep.subr.bf16.mxu0 %v1863_v63  ;;  %1028 = vmatprep.subr.bf16.mxu1 %v1865_v0  ;;  %v1943_v63 = vld [vmem:[#allocation5 + $0x384] ss:$16 sps:$4 sm:$0xff]   ;;  %v1946_v0 = vld [vmem:[#allocation5 + $0x38c] ss:$16 sps:$4 sm:$0xff]  }
  0x76   :  { %923 = vmatpush1.bf16.msra.mxu0 %v1867_v1  ;;  %1029 = vmatpush1.bf16.msra.mxu1 %v1868_v2  ;;  %v1941_v1 = vld [vmem:[#allocation5 + $0x380] ss:$16 sps:$4 sm:$0xff]   ;;  %v1944_v2 = vld [vmem:[#allocation5 + $0x388] ss:$16 sps:$4 sm:$0xff]  }
  0x77   :  { %945 = vmatprep.subr.bf16.mxu0 %v1871_v3  ;;  %1051 = vmatprep.subr.bf16.mxu1 %v1874_v6  ;;  %v1949_v3 = vld [vmem:[#allocation5 + $0x3a4] ss:$16 sps:$4 sm:$0xff]   ;;  %v1950_v6 = vld [vmem:[#allocation5 + $0x3a8] ss:$16 sps:$4 sm:$0xff]  }
  0x79   :  { %925 = vmatmul.mubr.bf16.vlgmr.msra.gmra.mrb[0].mxu0 %v94_v9  ;;  %1031 = vmatmul.mubr.bf16.vlgmr.msra.gmra.mrb[0].mxu1 %v94_v9  ;;  %v1953_v9 = vld [vmem:[#allocation5 + $0x3c0] ss:$16 sps:$4 sm:$0xff]  }
  0x7a   :  { %946 = vmatpush1.bf16.msra.mxu0 %v1869_v7  ;;  %1052 = vmatpush1.bf16.msra.mxu1 %v1872_v8  ;;  %v1955_v7 = vld [vmem:[#allocation5 + $0x3c4] ss:$16 sps:$4 sm:$0xff]   ;;  %v1958_v8 = vld [vmem:[#allocation5 + $0x3cc] ss:$16 sps:$4 sm:$0xff]  }
  0x7b   :  { %947 = vmatprep.subr.bf16.mxu0 %v1877_v10  ;;  %1053 = vmatprep.subr.bf16.mxu1 %v1880_v11  ;;  %v1956_v10 = vld [vmem:[#allocation5 + $0x3c8] ss:$16 sps:$4 sm:$0xff]   ;;  %v1961_v11 = vld [vmem:[#allocation5 + $0x3e4] ss:$16 sps:$4 sm:$0xff]  }
  0x7c   :  { %934 = vmatprep.mubr.bf16.mxu0 %v99_v30  ;;  %1040 = vmatprep.mubr.bf16.mxu1 %v99_v30  ;;  %v1972_v30 = vld [vmem:[#allocation7 + $0x88] sm:$0xff]  }
  0x7e   :  { %948 = vmatpush1.bf16.msra.mxu0 %v1875_v12  ;;  %1054 = vmatpush1.bf16.msra.mxu1 %v1878_v13  ;;  %v1964_v12 = vld [vmem:[#allocation5 + $0x3ec] ss:$16 sps:$4 sm:$0xff]   ;;  %v1959_v13 = vld [vmem:[#allocation5 + $0x3e0] ss:$16 sps:$4 sm:$0xff]  }
  0x7f   :  { %949 = vmatprep.subr.bf16.mxu0 %v1883_v14  ;;  %1055 = vmatprep.subr.bf16.mxu1 %v1886_v15  ;;  %v1962_v14 = vld [vmem:[#allocation5 + $0x3e8] ss:$16 sps:$4 sm:$0xff]   ;;  %v80_v15 = vld [vmem:[#allocation2 + $0x10] sm:$0xff] }
  0x81   :  { %935 = vmatmul.mubr.bf16.gmra.mrb[4].mxu0 %v98_v35  ;;  %1041 = vmatmul.mubr.bf16.gmra.mrb[4].mxu1 %v98_v35  ;;  %v1976_v35 = vld [vmem:[#allocation7 + $0x90] sm:$0xff]  }
  0x82   :  { %950 = vmatpush1.bf16.msra.mxu0 %v1881_v16  ;;  %1056 = vmatpush1.bf16.msra.mxu1 %v1884_v17  ;;  %v84_v16 = vld [vmem:[#allocation2 + $0x30] sm:$0xff]  ;;  %v89_v17 = vld [vmem:[#allocation2 + $0x58] sm:$0xff] }
  0x83   :  { %951 = vmatprep.subr.bf16.mxu0 %v1889_v18  ;;  %1057 = vmatprep.subr.bf16.mxu1 %v1892_v19  ;;  %v93_v18 = vld [vmem:[#allocation2 + $0x78] sm:$0xff]  ;;  %v1965_v19 = vld [vmem:[#allocation7 + $0x40] sm:$0xff]  }
  0x84   :  { %977 = vmatprep.mubr.bf16.mxu0 %v97_v44  ;;  %1083 = vmatprep.mubr.bf16.mxu1 %v97_v44  ;;  %v1985_v44 = vld [vmem:[#allocation7 + $0x68] sm:$0xff]  }
  0x86   :  { %952 = vmatpush1.bf16.msra.mxu0 %v1887_v20  ;;  %1058 = vmatpush1.bf16.msra.mxu1 %v1890_v21  ;;  %v1966_v20 = vld [vmem:[#allocation7 + $0xc0] sm:$0xff]   ;;  %v96_v21 = vpack.c.bf16 %v84_v16, %v80_v15 }
  0x87   :  { %953 = vmatprep.subr.bf16.mxu0 %v1895_v22  ;;  %1059 = vmatprep.subr.bf16.mxu1 %v1898_v23  ;;  %v101_v22 = vpack.c.bf16 %v93_v18, %v89_v17  ;;  %v1967_v23 = vld [vmem:[#allocation7] sm:$0xff]  }
  0x8a   :  { %954 = vmatpush1.bf16.msra.mxu0 %v1893_v24  ;;  %1060 = vmatpush1.bf16.msra.mxu1 %v1896_v25  ;;  %v1968_v24 = vld [vmem:[#allocation7 + $0x80] sm:$0xff]   ;;  %v1969_v25 = vld [vmem:[#allocation7 + $0x48] sm:$0xff]  }
  0x8b   :  { %955 = vmatprep.subr.bf16.mxu0 %v1901_v26  ;;  %1061 = vmatprep.subr.bf16.mxu1 %v1904_v27  ;;  %v1970_v26 = vld [vmem:[#allocation7 + $0xc8] sm:$0xff]   ;;  %v88_v27 = vld [vmem:[#allocation2 + $0x50] sm:$0xff] }
  0x8e   :  { %956 = vmatpush1.bf16.msra.mxu0 %v1899_v33  ;;  %1062 = vmatpush1.bf16.msra.mxu1 %v1902_v34  ;;  %v100_v33 = vpack.c.bf16 %v92_v28, %v88_v27  ;;  %v1975_v34 = vld [vmem:[#allocation7 + $0x10] sm:$0xff]  }
  0x8f   :  { %957 = vmatprep.subr.bf16.mxu0 %v1907_v36  ;;  %1063 = vmatprep.subr.bf16.mxu1 %v1910_v37  ;;  %v1977_v36 = vld [vmem:[#allocation7 + $0x58] sm:$0xff]  }
  0x90   :  { %v1978_v37 = vld [vmem:[#allocation7 + $0xd8] sm:$0xff]  }
  0x92   :  { %958 = vmatpush1.bf16.msra.mxu0 %v1905_v38  ;;  %1064 = vmatpush1.bf16.msra.mxu1 %v1908_v39  ;;  %v1979_v38 = vld [vmem:[#allocation7 + $0x18] sm:$0xff]  }
  0x93   :  { %959 = vmatprep.subr.bf16.mxu0 %v1913_v42  ;;  %1065 = vmatprep.subr.bf16.mxu1 %v1916_v43  ;;  %v1980_v39 = vld [vmem:[#allocation7 + $0x98] sm:$0xff]   ;;  %v1983_v42 = vld [vmem:[#allocation7 + $0x20] sm:$0xff]  }
  0x94   :  { %v1984_v43 = vld [vmem:[#allocation7 + $0xa0] sm:$0xff]  }
  0x96   :  { %960 = vmatpush1.bf16.msra.mxu0 %v1911_v45  ;;  %1066 = vmatpush1.bf16.msra.mxu1 %v1914_v46  ;;  %v1986_v45 = vld [vmem:[#allocation7 + $0xe8] sm:$0xff]  }
  0x97   :  { %961 = vmatprep.subr.bf16.mxu0 %v1919_v47  ;;  %1067 = vmatprep.subr.bf16.mxu1 %v1922_v48  ;;  %v1987_v46 = vld [vmem:[#allocation7 + $0x28] sm:$0xff]   ;;  %v1989_v48 = vld [vmem:[#allocation7 + $0x70] sm:$0xff]  }
  0x98   :  { %v1988_v47 = vld [vmem:[#allocation7 + $0xa8] sm:$0xff]  }
  0x9a   :  { %962 = vmatpush1.bf16.msra.mxu0 %v1917_v49  ;;  %1068 = vmatpush1.bf16.msra.mxu1 %v1920_v50  ;;  %v1990_v49 = vld [vmem:[#allocation7 + $0xf0] sm:$0xff]  }
  0x9b   :  { %963 = vmatprep.subr.bf16.mxu0 %v1925_v51  ;;  %1069 = vmatprep.subr.bf16.mxu1 %v1928_v52  ;;  %v1991_v50 = vld [vmem:[#allocation7 + $0x30] sm:$0xff]   ;;  %v1993_v52 = vld [vmem:[#allocation7 + $0x78] sm:$0xff]  }
  0x9c   :  { %v1992_v51 = vld [vmem:[#allocation7 + $0xb0] sm:$0xff]  }
  0x9e   :  { %964 = vmatpush1.bf16.msra.mxu0 %v1923_v53  ;;  %1070 = vmatpush1.bf16.msra.mxu1 %v1926_v54  ;;  %v1994_v53 = vld [vmem:[#allocation7 + $0xf8] sm:$0xff]  }
  0x9f   :  { %965 = vmatprep.subr.bf16.mxu0 %v1931_v55  ;;  %1071 = vmatprep.subr.bf16.mxu1 %v1934_v56  ;;  %v1995_v54 = vld [vmem:[#allocation7 + $0x38] sm:$0xff]   ;;  %v232_v56 = vlaneseq }
  0xa0   :  { %v1996_v55 = vld [vmem:[#allocation7 + $0xb8] sm:$0xff]  }
  0xa2   :  { %966 = vmatpush1.bf16.msra.mxu0 %v1929_v57  ;;  %1072 = vmatpush1.bf16.msra.mxu1 %v1932_v58  ;;  %v233_v57 = vshrl.u32 %v232_v56, 7 }
  0xa3   :  { %967 = vmatprep.subr.bf16.mxu0 %v1937_v59  ;;  %1073 = vmatprep.subr.bf16.mxu1 %v1940_v60  ;;  %v230_v60 = vld [vmem:[%s2189_s2] sm:$0xf] }
  0xa4   :  { %v234_v58 = vsub.s32 0, %v233_v57  ;;  %v242_v59 = vsub.s32 2, %v233_v57 }
  0xa6   :  { %968 = vmatpush1.bf16.msra.mxu0 %v1935_v61  ;;  %1074 = vmatpush1.bf16.msra.mxu1 %v1938_v62  ;;  %v238_v61 = vsub.s32 1, %v233_v57  ;;  %v246_v62 = vsub.s32 3, %v233_v57 }
  0xa7   :  { %969 = vmatprep.subr.bf16.mxu0 %v1943_v63  ;;  %1075 = vmatprep.subr.bf16.mxu1 %v1946_v0  ;;  %v235_v63 = vrot.slane %v230_v60, %v234_v58  ;;  %v243_v0 = vrot.slane %v230_v60, %v242_v59 }
  0xaa   :  { %970 = vmatpush1.bf16.msra.mxu0 %v1941_v1  ;;  %1076 = vmatpush1.bf16.msra.mxu1 %v1944_v2  ;;  %v239_v1 = vrot.slane %v230_v60, %v238_v61  ;;  %v247_v2 = vrot.slane %v230_v60, %v246_v62 }
  0xab   :  { %971 = vmatprep.subr.bf16.mxu0 %v1949_v3  ;;  %1077 = vmatprep.subr.bf16.mxu1 %v1952_v4 }
  0xae   :  { %972 = vmatpush1.bf16.msra.mxu0 %v1947_v5  ;;  %1078 = vmatpush1.bf16.msra.mxu1 %v1950_v6 }
  0xaf   :  { %973 = vmatprep.subr.bf16.mxu0 %v1955_v7  ;;  %1079 = vmatprep.subr.bf16.mxu1 %v1958_v8 }
  0xb2   :  { %974 = vmatpush1.bf16.msra.mxu0 %v1953_v9  ;;  %1080 = vmatpush1.bf16.msra.mxu1 %v1956_v10 }
  0xb3   :  { %975 = vmatprep.subr.bf16.mxu0 %v1961_v11  ;;  %1081 = vmatprep.subr.bf16.mxu1 %v1964_v12 }
  0xb6   :  { %976 = vmatpush1.bf16.msra.mxu0 %v1959_v13  ;;  %1082 = vmatpush1.bf16.msra.mxu1 %v1962_v14 }
  0xb7   :  { %1673 = vmatprep.subr.bf16.mxu0 %v1965_v19  ;;  %1701 = vmatprep.subr.bf16.mxu1 %v1966_v20 }
  0xb9   :  { %978 = vmatmul.mubr.bf16.vlgmr.msra.gmra.mrb[0].mxu0 %v96_v21  ;;  %1084 = vmatmul.mubr.bf16.vlgmr.msra.gmra.mrb[0].mxu1 %v96_v21 }
  0xba   :  { %987 = vmatprep.mubr.bf16.mxu0 %v101_v22  ;;  %1093 = vmatprep.mubr.bf16.mxu1 %v101_v22 }
  0xbb   :  { %1674 = vmatpush3.bf16.msra.mxu0 %v1967_v23  ;;  %1702 = vmatpush3.bf16.msra.mxu1 %v1968_v24 }
  0xbc   :  { %1675 = vmatprep.subr.bf16.mxu0 %v1969_v25  ;;  %1703 = vmatprep.subr.bf16.mxu1 %v1970_v26 }
  0xbf   :  { %1676 = vmatpush3.bf16.msra.mxu0 %v1971_v29  ;;  %1704 = vmatpush3.bf16.msra.mxu1 %v1972_v30 }
  0xc0   :  { %1677 = vmatprep.subr.bf16.mxu0 %v1973_v31  ;;  %1705 = vmatprep.subr.bf16.mxu1 %v1974_v32 }
  0xc1   :  { %988 = vmatmul.mubr.bf16.gmra.mrb[4].mxu0 %v100_v33  ;;  %1094 = vmatmul.mubr.bf16.gmra.mrb[4].mxu1 %v100_v33 }
  0xc3   :  { %1678 = vmatpush3.bf16.msra.mxu0 %v1975_v34  ;;  %1706 = vmatpush3.bf16.msra.mxu1 %v1976_v35 }
  0xc4   :  { %1679 = vmatprep.subr.bf16.mxu0 %v1977_v36  ;;  %1707 = vmatprep.subr.bf16.mxu1 %v1978_v37 }
  0xc7   :  { %1680 = vmatpush3.bf16.msra.mxu0 %v1979_v38  ;;  %1708 = vmatpush3.bf16.msra.mxu1 %v1980_v39 }
  0xc8   :  { %1681 = vmatprep.subr.bf16.mxu0 %v1981_v40  ;;  %1709 = vmatprep.subr.bf16.mxu1 %v1982_v41 }
  0xcb   :  { %1682 = vmatpush3.bf16.msra.mxu0 %v1983_v42  ;;  %1710 = vmatpush3.bf16.msra.mxu1 %v1984_v43 }
  0xcc   :  { %1683 = vmatprep.subr.bf16.mxu0 %v1985_v44  ;;  %1711 = vmatprep.subr.bf16.mxu1 %v1986_v45 }
  0xcf   :  { %1684 = vmatpush3.bf16.msra.mxu0 %v1987_v46  ;;  %1712 = vmatpush3.bf16.msra.mxu1 %v1988_v47 }
  0xd0   :  { %1685 = vmatprep.subr.bf16.mxu0 %v1989_v48  ;;  %1713 = vmatprep.subr.bf16.mxu1 %v1990_v49 }
  0xd3   :  { %1686 = vmatpush3.bf16.msra.mxu0 %v1991_v50  ;;  %1714 = vmatpush3.bf16.msra.mxu1 %v1992_v51 }
  0xd4   :  { %1687 = vmatprep.subr.bf16.mxu0 %v1993_v52  ;;  %1715 = vmatprep.subr.bf16.mxu1 %v1994_v53 }
  0xd7   :  { %1688 = vmatpush3.bf16.msra.mxu0 %v1995_v54  ;;  %1716 = vmatpush3.bf16.msra.mxu1 %v1996_v55 }
 0x18c   :  { %v979_v3 = vpop.f32.mrb[0].mxu0  ;;  %v1085_v4 = vpop.f32.mrb[0].mxu1 }
 0x18d   :  { %v1729_v5 = vadd.f32 %v979_v3, %v235_v63  ;;  %v1737_v6 = vadd.f32 %v1085_v4, %v243_v0  ;;  %v981_v7 = vpop.f32.mrb[1].mxu0  ;;  %v1087_v8 = vpop.f32.mrb[1].mxu1  ;;  %v1512_v3 = vld [vmem:[%s2191_s4] ss:$0 sm:$0xff]  ;;  %s2100_s4 = smov [#allocation8]  }
 0x18e   :  { %v1730_v9 = vadd.f32 %v981_v7, %v239_v1  ;;  %v1738_v10 = vadd.f32 %v1087_v8, %v247_v2  ;;  %v983_v11 = vpop.f32.mrb[2].mxu0  ;;  %v1089_v12 = vpop.f32.mrb[2].mxu1  ;;  %s1499_s10 = sshll.u32 %s2100_s4, 4  ;;  %s1500_s10 = int_to_ptr.vmem [resolvable:$true] %s1499_s10 }
 0x18f   :  { %v1731_v13 = vadd.f32 %v983_v11, %v235_v63  ;;  %v1739_v14 = vadd.f32 %v1089_v12, %v243_v0  ;;  %v985_v15 = vpop.f32.mrb[3].mxu0  ;;  %v1091_v16 = vpop.f32.mrb[3].mxu1  ;;  %v1104_v19 = vmax.f32 %v1729_v5, 0.0  ;;  %v1106_v20 = vmax.f32 %v1737_v6, 0.0  ;;  %s2063_s11 = scalar_lea.vmem %s1500_s10, 512  ;;  %p2068_p11 = scmp.lt.s32.totalorder %s1500_s10, %s1500_s10 }
 0x190   :  { %v1732_v17 = vadd.f32 %v985_v15, %v239_v1  ;;  %v1740_v18 = vadd.f32 %v1091_v16, %v247_v2  ;;  %v1105_v23 = vmax.f32 %v1730_v9, 0.0  ;;  %v1107_v24 = vmax.f32 %v1738_v10, 0.0  ;;  %p2064_p10 = scmp.ne.s32.totalorder %s1500_s10, %s2063_s11  ;;  %p2069_p12 = scmp.lt.s32.totalorder %s2063_s11, %s2063_s11 }
 0x191   :  { %v1108_v21 = vmax.f32 %v1731_v13, 0.0  ;;  %v1110_v22 = vmax.f32 %v1739_v14, 0.0 }
 0x192   :  { %v1109_v25 = vmax.f32 %v1732_v17, 0.0  ;;  %v1111_v26 = vmax.f32 %v1740_v18, 0.0  ;;  %p2070_p13 = por %p2069_p12, %p2068_p11 }
 0x193   :  { %v1124_v27 = vpack.c.bf16 %v1108_v21, %v1104_v19  ;;  %v1126_v28 = vpack.c.bf16 %v1110_v22, %v1106_v20 }
 0x194   :  { %v1125_v29 = vpack.c.bf16 %v1109_v25, %v1105_v23  ;;  %v1127_v30 = vpack.c.bf16 %v1111_v26, %v1107_v24  ;;  %v989_v31 = vpop.f32.mrb[4].mxu0  ;;  %v1095_v32 = vpop.f32.mrb[4].mxu1  ;;  %p2071_p0 = pnand %p2070_p13, %p2064_p10 }
 0x195   :  { %v1733_v33 = vadd.f32 %v989_v31, %v235_v63  ;;  %v1741_v34 = vadd.f32 %v1095_v32, %v243_v0  ;;  %v991_v35 = vpop.f32.mrb[5].mxu0  ;;  %v1097_v36 = vpop.f32.mrb[5].mxu1 }
 0x196   :  { %v1734_v37 = vadd.f32 %v991_v35, %v239_v1  ;;  %v1742_v38 = vadd.f32 %v1097_v36, %v247_v2  ;;  %v993_v39 = vpop.f32.mrb[6].mxu0  ;;  %v1099_v40 = vpop.f32.mrb[6].mxu1  ;;  %1420 = vmatprep.mubr.bf16.mxu0 %v1125_v29  ;;  %1469 = vmatprep.mubr.bf16.mxu1 %v1127_v30 }
 0x197   :  { %v1735_v41 = vadd.f32 %v993_v39, %v235_v63  ;;  %v1743_v42 = vadd.f32 %v1099_v40, %v243_v0  ;;  %v995_v43 = vpop.f32.mrb[7].mxu0  ;;  %v1101_v44 = vpop.f32.mrb[7].mxu1  ;;  %1421 = vmatmul.mubr.bf16.vlgmr.msra.gmra.mrb[8].mxu0 %v1124_v27  ;;  %1470 = vmatmul.mubr.bf16.vlgmr.msra.gmra.mrb[8].mxu1 %v1126_v28  ;;  %v1112_v47 = vmax.f32 %v1733_v33, 0.0  ;;  %v1114_v48 = vmax.f32 %v1741_v34, 0.0 }
 0x198   :  { %v1736_v45 = vadd.f32 %v995_v43, %v239_v1  ;;  %v1744_v46 = vadd.f32 %v1101_v44, %v247_v2  ;;  %v1113_v51 = vmax.f32 %v1734_v37, 0.0  ;;  %v1115_v52 = vmax.f32 %v1742_v38, 0.0 }
 0x199   :  { %v1116_v49 = vmax.f32 %v1735_v41, 0.0  ;;  %v1118_v50 = vmax.f32 %v1743_v42, 0.0 }
 0x19a   :  { %v1117_v53 = vmax.f32 %v1736_v45, 0.0  ;;  %v1119_v54 = vmax.f32 %v1744_v46, 0.0 }
 0x19b   :  { %v1128_v55 = vpack.c.bf16 %v1116_v49, %v1112_v47  ;;  %v1130_v56 = vpack.c.bf16 %v1118_v50, %v1114_v48 }
 0x19c   :  { %v1129_v57 = vpack.c.bf16 %v1117_v53, %v1113_v51  ;;  %v1131_v58 = vpack.c.bf16 %v1119_v54, %v1115_v52 }
 0x19e   :  { %1428 = vmatprep.mubr.bf16.mxu0 %v1129_v57  ;;  %1477 = vmatprep.mubr.bf16.mxu1 %v1131_v58 }
 0x19f   :  { %1429 = vmatmul.mubr.bf16.gmra.mrb[12].mxu0 %v1128_v55  ;;  %1478 = vmatmul.mubr.bf16.gmra.mrb[12].mxu1 %v1130_v56 }
 0x26a   :  { %v1689_v59 = vpop.f32.mrb[8].mxu0  ;;  %v1717_v60 = vpop.f32.mrb[8].mxu1 }
 0x26b   :  { %v1690_v61 = vpop.f32.mrb[9].mxu0  ;;  %v1718_v62 = vpop.f32.mrb[9].mxu1 }
 0x26c   :  { %v1691_v63 = vadd.f32 %v1690_v61, %v1689_v59  ;;  %v1719_v0 = vadd.f32 %v1718_v62, %v1717_v60  ;;  %v1692_v1 = vpop.f32.mrb[10].mxu0  ;;  %v1720_v2 = vpop.f32.mrb[10].mxu1 }
 0x26d   :  { %v1693_v4 = vpop.f32.mrb[11].mxu0  ;;  %v1721_v5 = vpop.f32.mrb[11].mxu1 }
 0x26e   :  { %v1472_v6 = vadd.f32 %v1719_v0, %v1691_v63  ;;  %v1694_v7 = vadd.f32 %v1693_v4, %v1692_v1  ;;  %v1722_v8 = vadd.f32 %v1721_v5, %v1720_v2 }
 0x270   :  { %v1486_v9 = vadd.f32 %v1512_v3, %v1472_v6  ;;  %v1475_v10 = vadd.f32 %v1722_v8, %v1694_v7 }
 0x272   :  { %1490 = vst [vmem:[#allocation8] sm:$0xff] %v1486_v9  ;;  %v1487_v11 = vadd.f32 %v1512_v3, %v1475_v10  ;;  %v1695_v12 = vpop.f32.mrb[12].mxu0  ;;  %v1723_v13 = vpop.f32.mrb[12].mxu1 }
 0x273   :  { %v1696_v14 = vpop.f32.mrb[13].mxu0  ;;  %v1724_v15 = vpop.f32.mrb[13].mxu1 }
 0x274   :  { %1491 = vst [vmem:[#allocation8 + $0x8] sm:$0xff] %v1487_v11  ;;  %v1697_v16 = vadd.f32 %v1696_v14, %v1695_v12  ;;  %v1725_v17 = vadd.f32 %v1724_v15, %v1723_v13  ;;  %v1698_v18 = vpop.f32.mrb[14].mxu0  ;;  %v1726_v19 = vpop.f32.mrb[14].mxu1 }
 0x275   :  { %v1699_v20 = vpop.f32.mrb[15].mxu0  ;;  %v1727_v21 = vpop.f32.mrb[15].mxu1 }
 0x276   :  { %v1480_v22 = vadd.f32 %v1725_v17, %v1697_v16  ;;  %v1700_v23 = vadd.f32 %v1699_v20, %v1698_v18  ;;  %v1728_v24 = vadd.f32 %v1727_v21, %v1726_v19 }
 0x278   :  { %v1488_v25 = vadd.f32 %v1512_v3, %v1480_v22  ;;  %v1483_v26 = vadd.f32 %v1728_v24, %v1700_v23 }
 0x27a   :  { %1492 = vst [vmem:[#allocation8 + $0x10] sm:$0xff] %v1488_v25  ;;  %v1489_v27 = vadd.f32 %v1512_v3, %v1483_v26 }
 0x27c   :  { %1493 = vst [vmem:[#allocation8 + $0x18] sm:$0xff] %v1489_v27 }
 0x27d   :  { %2074 = shalt.err (!%p2071_p0)
}
 0x27e   :  { %s2075_s14 = scalar_lea.hbm %s2192_s5, 512 }
 0x27f   :  { %p2076_p1 = scmp.ne.s32.totalorder %s2192_s5, %s2075_s14  ;;  %p2079_p2 = scmp.lt.u32.totalorder %s2075_s14, %s2192_s5 }
 0x281   :  { %p2081_p3 = pnand %p2079_p2, %p2076_p1 }
 0x283   :  { %2084 = shalt.err (!%p2081_p3)
}
 0x284   :  { %s2101_s18 = smov 128   ;;  %s2102_s19 = smov 8  }
 0x285   :  { %1505 = dma.vmem_to_hbm [thread:$0]  %s1500_s10, 512, %s2192_s5, [#allocation4], %s2101_s18, %s2101_s18, %s2102_s19  }
 0x286   :  { %2089 = dma.done.wait [#allocation4], 512  }
 0x287   :  { %2090 = vsyncadd [#allocation4], 4294966784 }
 0x288   :  { %1509 = vsyncpa [#allocation3], 1 }
 0x289   :  { %1510 = vsyncpa [#allocation6], 1 }
 0x28a   :  { %1511 = vsyncpa [#allocation4], 1 }

</bundles_post_ra>
